<compile_context>
chip_gen: v5e
topology: v5e:2x2
jax: 0.10.0
libtpu: 0.0.40
codegen_flags: <defaults>
</compile_context>

<pallas_src>
import jax
import jax.numpy as jnp
from jax.experimental import pallas as pl
from jax.experimental.pallas import tpu as pltpu

IN_DIM = 28 * 28
HID = 300
OUT_DIM = 10
OUT_PAD = 128                 # lane-dense output slab; logits live in columns [:10]
TILE_B_MAX = 1024             # sweepable up to ~2048 (raise VMEM_LIMIT_BYTES with it)
VMEM_LIMIT_BYTES = 40 * 1024 * 1024


def _cdiv(a, b):
    return (a + b - 1) // b


def _round_up(n, m):
    return _cdiv(n, m) * m


def _choose_tile(batch):
    """Balanced batch tiling.

    Pick the number of tiles first (>=2 whenever the batch is big enough, so the
    "parallel" batch axis actually shards across v7x's two TensorCores), then
    size each tile as a multiple of 16 rows.  The ragged last tile is handled by
    Pallas partial-block DMA + masked writeback, so no jnp.pad pass is needed.
    """
    num_tiles = _cdiv(batch, TILE_B_MAX)
    if batch > 32:
        num_tiles = max(num_tiles, 2)
    return _round_up(_cdiv(batch, num_tiles), 16)


def fcn_kernel(x_ref,
               w1_ref, b1_ref,
               w2_ref, b2_ref,
               w3_ref, b3_ref,
               w4_ref, b4_ref,
               o_ref):
    # x arrives f32 (no wrapper-side cast pass over HBM); cast to bf16 on-chip so
    # the MXU sees its native input dtype.  Accumulation is f32
    # (preferred_element_type); bias-add + ReLU stay f32 on the VPU.
    x = x_ref[...].astype(jnp.bfloat16)

    h = jnp.dot(x, w1_ref[...], preferred_element_type=jnp.float32)
    h = jnp.maximum(h + b1_ref[...], 0.0)

    h = jnp.dot(h.astype(jnp.bfloat16), w2_ref[...],
                preferred_element_type=jnp.float32)
    h = jnp.maximum(h + b2_ref[...], 0.0)

    h = jnp.dot(h.astype(jnp.bfloat16), w3_ref[...],
                preferred_element_type=jnp.float32)
    h = jnp.maximum(h + b3_ref[...], 0.0)

    out = jnp.dot(h.astype(jnp.bfloat16), w4_ref[...],
                  preferred_element_type=jnp.float32)
    o_ref[...] = (out + b4_ref[...]).astype(o_ref.dtype)


def prepare_params(params):
    """One-time parameter prep (hoisted out of the per-call forward).

    bf16 weights (native MXU dtype, half the HBM bytes), f32 biases, and the
    last layer zero-padded to a lane-dense 128-wide output slab.
    """
    (w1, b1), (w2, b2), (w3, b3), (w4, b4) = params
    w4p = jnp.zeros((HID, OUT_PAD), jnp.bfloat16).at[:, :OUT_DIM].set(
        w4.astype(jnp.bfloat16))
    b4p = jnp.zeros((1, OUT_PAD), jnp.float32).at[:, :OUT_DIM].set(
        b4.astype(jnp.float32))
    return (w1.astype(jnp.bfloat16), b1.astype(jnp.float32),
            w2.astype(jnp.bfloat16), b2.astype(jnp.float32),
            w3.astype(jnp.bfloat16), b3.astype(jnp.float32),
            w4p, b4p)


@jax.jit
def fcn_forward(x, prepped):
    """x: any shape reshapeable to (-1, 784); prepped: output of prepare_params."""
    x2 = jnp.reshape(x, (-1, IN_DIM))
    if x2.dtype != jnp.float32:
        x2 = x2.astype(jnp.float32)
    B = x2.shape[0]

    tile_b = _choose_tile(B)
    grid = (_cdiv(B, tile_b),)

    w1b, b1f, w2b, b2f, w3b, b3f, w4p, b4p = prepped

    const = lambda i: (0, 0)   # weights/biases: DMA once, VMEM-resident

    flops = 2 * B * (IN_DIM * HID + HID * HID + HID * HID + HID * OUT_PAD)
    bytes_accessed = (
        x2.size * 4
        + (w1b.size + w2b.size + w3b.size + w4p.size) * 2
        + (b1f.size + b2f.size + b3f.size + b4p.size) * 4
        + B * OUT_PAD * 4)

    out = pl.pallas_call(
        fcn_kernel,
        out_shape=jax.ShapeDtypeStruct((B, OUT_PAD), jnp.float32),
        grid=grid,
        in_specs=[
            pl.BlockSpec((tile_b, IN_DIM), lambda i: (i, 0)),
            pl.BlockSpec((IN_DIM, HID), const), pl.BlockSpec((1, HID), const),
            pl.BlockSpec((HID, HID), const),    pl.BlockSpec((1, HID), const),
            pl.BlockSpec((HID, HID), const),    pl.BlockSpec((1, HID), const),
            pl.BlockSpec((HID, OUT_PAD), const), pl.BlockSpec((1, OUT_PAD), const),
        ],
        out_specs=pl.BlockSpec((tile_b, OUT_PAD), lambda i: (i, 0)),
        compiler_params=pltpu.CompilerParams(
            dimension_semantics=("parallel",),
            vmem_limit_bytes=VMEM_LIMIT_BYTES),
        cost_estimate=pl.CostEstimate(
            flops=flops, transcendentals=0, bytes_accessed=bytes_accessed),
    )(x2, w1b, b1f, w2b, b2f, w3b, b3f, w4p, b4p)

    # Logits live in columns [:10] of the lane-dense slab.  Consumers that can
    # take the padded slab directly may skip this slice (saves one HBM pass).
    return out[:, :OUT_DIM]


def init_params(key):
    """Deterministic init mimicking nn.Linear's uniform(-1/sqrt(fan_in), 1/sqrt(fan_in))."""
    dims = [(IN_DIM, HID), (HID, HID), (HID, HID), (HID, OUT_DIM)]
    params = []
    for (fan_in, fan_out) in dims:
        key, kw, kb = jax.random.split(key, 3)
        bound = 1.0 / jnp.sqrt(float(fan_in))
        W = jax.random.uniform(kw, (fan_in, fan_out), jnp.float32, -bound, bound)
        b = jax.random.uniform(kb, (1, fan_out), jnp.float32, -bound, bound)
        params.append((W, b))
    return params


def fcn_reference(x, params):
    """Plain-JAX reference mirroring the kernel's bf16-weight / f32-accum arithmetic."""
    h = jnp.reshape(x, (-1, IN_DIM)).astype(jnp.bfloat16)
    for i, (W, b) in enumerate(params):
        h = jnp.dot(h, W.astype(jnp.bfloat16),
                    preferred_element_type=jnp.float32) + b.astype(jnp.float32)
        if i != len(params) - 1:
            h = jnp.maximum(h, 0.0).astype(jnp.bfloat16)
    return h


if __name__ == "__main__":
    key = jax.random.PRNGKey(0)
    kx, kp = jax.random.split(key)

    params = init_params(kp)
    prepped = prepare_params(params)   # one-time: bf16 casts + last-layer padding

    # MNIST-like input: (batch=8, channels=1, 28, 28), flattened inside forward.
    x = jax.random.normal(kx, (8, 1, 28, 28), jnp.float32)

    out = fcn_forward(x, prepped)
    out = jax.block_until_ready(out)

    ref = fcn_reference(x, params)
    assert out.shape == (8, 10), out.shape
    assert jnp.allclose(out, ref, atol=1e-2, rtol=1e-2), "mismatch vs reference"

    print("KERNEL_OK")
</pallas_src>

<mosaic_0001>
module attributes {stable_mosaic.version = 11 : i64} {
  func.func @fcn_kernel(%arg0: i32, %arg1: memref<16x784xf32, #tpu.memory_space<vmem>>, %arg2: memref<784x300xbf16, #tpu.memory_space<vmem>>, %arg3: memref<1x300xf32, #tpu.memory_space<vmem>>, %arg4: memref<300x300xbf16, #tpu.memory_space<vmem>>, %arg5: memref<1x300xf32, #tpu.memory_space<vmem>>, %arg6: memref<300x300xbf16, #tpu.memory_space<vmem>>, %arg7: memref<1x300xf32, #tpu.memory_space<vmem>>, %arg8: memref<300x128xbf16, #tpu.memory_space<vmem>>, %arg9: memref<1x128xf32, #tpu.memory_space<vmem>>, %arg10: memref<16x128xf32, #tpu.memory_space<vmem>>) attributes {dimension_semantics = [#tpu.dimension_semantics<parallel>], iteration_bounds = array<i64: 1>, scalar_prefetch = 0 : i64, scratch_operands = 0 : i64, tpu.core_type = #tpu.core_type<tc>, window_params = [{transform_indices = @transform_0, window_bounds = array<i64: 16, 784>}, {pipeline_mode = #tpu.pipeline_mode<synchronous>, transform_indices = @transform_1, window_bounds = array<i64: 784, 300>}, {pipeline_mode = #tpu.pipeline_mode<synchronous>, transform_indices = @transform_2, window_bounds = array<i64: 1, 300>}, {pipeline_mode = #tpu.pipeline_mode<synchronous>, transform_indices = @transform_3, window_bounds = array<i64: 300, 300>}, {pipeline_mode = #tpu.pipeline_mode<synchronous>, transform_indices = @transform_4, window_bounds = array<i64: 1, 300>}, {pipeline_mode = #tpu.pipeline_mode<synchronous>, transform_indices = @transform_5, window_bounds = array<i64: 300, 300>}, {pipeline_mode = #tpu.pipeline_mode<synchronous>, transform_indices = @transform_6, window_bounds = array<i64: 1, 300>}, {pipeline_mode = #tpu.pipeline_mode<synchronous>, transform_indices = @transform_7, window_bounds = array<i64: 300, 128>}, {pipeline_mode = #tpu.pipeline_mode<synchronous>, transform_indices = @transform_8, window_bounds = array<i64: 1, 128>}, {transform_indices = @transform_9, window_bounds = array<i64: 16, 128>}]} {
    %c0 = arith.constant 0 : index
    %c0_0 = arith.constant 0 : index
    %0 = vector.load %arg1[%c0, %c0_0] : memref<16x784xf32, #tpu.memory_space<vmem>>, vector<16x784xf32>
    %1 = arith.truncf %0 : vector<16x784xf32> to vector<16x784xbf16>
    %c0_1 = arith.constant 0 : index
    %c0_2 = arith.constant 0 : index
    %2 = vector.load %arg2[%c0_1, %c0_2] : memref<784x300xbf16, #tpu.memory_space<vmem>>, vector<784x300xbf16>
    %cst = arith.constant dense<0.000000e+00> : vector<16x300xf32>
    %3 = tpu.matmul %1, %2, %cst {dimension_numbers = #tpu.dot_dimension_numbers<[1], [0], [0], [1], [0, 0, 1, 1], [], []>} : vector<16x784xbf16>, vector<784x300xbf16>, vector<16x300xf32> -> vector<16x300xf32>
    %c0_3 = arith.constant 0 : index
    %c0_4 = arith.constant 0 : index
    %4 = vector.load %arg3[%c0_3, %c0_4] : memref<1x300xf32, #tpu.memory_space<vmem>>, vector<1x300xf32>
    %5 = vector.broadcast %4 : vector<1x300xf32> to vector<16x300xf32>
    %6 = arith.addf %3, %5 : vector<16x300xf32>
    %cst_5 = arith.constant 0.000000e+00 : f32
    %7 = vector.broadcast %cst_5 : f32 to vector<16x300xf32>
    %8 = arith.maximumf %6, %7 : vector<16x300xf32>
    %9 = arith.truncf %8 : vector<16x300xf32> to vector<16x300xbf16>
    %c0_6 = arith.constant 0 : index
    %c0_7 = arith.constant 0 : index
    %10 = vector.load %arg4[%c0_6, %c0_7] : memref<300x300xbf16, #tpu.memory_space<vmem>>, vector<300x300xbf16>
    %cst_8 = arith.constant dense<0.000000e+00> : vector<16x300xf32>
    %11 = tpu.matmul %9, %10, %cst_8 {dimension_numbers = #tpu.dot_dimension_numbers<[1], [0], [0], [1], [0, 0, 1, 1], [], []>} : vector<16x300xbf16>, vector<300x300xbf16>, vector<16x300xf32> -> vector<16x300xf32>
    %c0_9 = arith.constant 0 : index
    %c0_10 = arith.constant 0 : index
    %12 = vector.load %arg5[%c0_9, %c0_10] : memref<1x300xf32, #tpu.memory_space<vmem>>, vector<1x300xf32>
    %13 = vector.broadcast %12 : vector<1x300xf32> to vector<16x300xf32>
    %14 = arith.addf %11, %13 : vector<16x300xf32>
    %cst_11 = arith.constant 0.000000e+00 : f32
    %15 = vector.broadcast %cst_11 : f32 to vector<16x300xf32>
    %16 = arith.maximumf %14, %15 : vector<16x300xf32>
    %17 = arith.truncf %16 : vector<16x300xf32> to vector<16x300xbf16>
    %c0_12 = arith.constant 0 : index
    %c0_13 = arith.constant 0 : index
    %18 = vector.load %arg6[%c0_12, %c0_13] : memref<300x300xbf16, #tpu.memory_space<vmem>>, vector<300x300xbf16>
    %cst_14 = arith.constant dense<0.000000e+00> : vector<16x300xf32>
    %19 = tpu.matmul %17, %18, %cst_14 {dimension_numbers = #tpu.dot_dimension_numbers<[1], [0], [0], [1], [0, 0, 1, 1], [], []>} : vector<16x300xbf16>, vector<300x300xbf16>, vector<16x300xf32> -> vector<16x300xf32>
    %c0_15 = arith.constant 0 : index
    %c0_16 = arith.constant 0 : index
    %20 = vector.load %arg7[%c0_15, %c0_16] : memref<1x300xf32, #tpu.memory_space<vmem>>, vector<1x300xf32>
    %21 = vector.broadcast %20 : vector<1x300xf32> to vector<16x300xf32>
    %22 = arith.addf %19, %21 : vector<16x300xf32>
    %cst_17 = arith.constant 0.000000e+00 : f32
    %23 = vector.broadcast %cst_17 : f32 to vector<16x300xf32>
    %24 = arith.maximumf %22, %23 : vector<16x300xf32>
    %25 = arith.truncf %24 : vector<16x300xf32> to vector<16x300xbf16>
    %c0_18 = arith.constant 0 : index
    %c0_19 = arith.constant 0 : index
    %26 = vector.load %arg8[%c0_18, %c0_19] : memref<300x128xbf16, #tpu.memory_space<vmem>>, vector<300x128xbf16>
    %cst_20 = arith.constant dense<0.000000e+00> : vector<16x128xf32>
    %27 = tpu.matmul %25, %26, %cst_20 {dimension_numbers = #tpu.dot_dimension_numbers<[1], [0], [0], [1], [0, 0, 1, 1], [], []>} : vector<16x300xbf16>, vector<300x128xbf16>, vector<16x128xf32> -> vector<16x128xf32>
    %c0_21 = arith.constant 0 : index
    %c0_22 = arith.constant 0 : index
    %28 = vector.load %arg9[%c0_21, %c0_22] : memref<1x128xf32, #tpu.memory_space<vmem>>, vector<1x128xf32>
    %29 = vector.broadcast %28 : vector<1x128xf32> to vector<16x128xf32>
    %30 = arith.addf %27, %29 : vector<16x128xf32>
    %c0_23 = arith.constant 0 : index
    %c0_24 = arith.constant 0 : index
    %31 = vector.load %arg10[%c0_23, %c0_24] : memref<16x128xf32, #tpu.memory_space<vmem>>, vector<16x128xf32>
    tpu.vector_store %arg10[%c0_23, %c0_24], %30 {strides = array<i32>} : memref<16x128xf32, #tpu.memory_space<vmem>>, vector<16x128xf32>,
    return
  }
  func.func @transform_0(%arg0: i32) -> (i32, i32) {
    %c0_i32 = arith.constant 0 : i32
    %c0_i32_0 = arith.constant 0 : i32
    return %arg0, %c0_i32 : i32, i32
  }
  func.func @transform_1(%arg0: i32) -> (i32, i32) {
    %c0_i32 = arith.constant 0 : i32
    %c0_i32_0 = arith.constant 0 : i32
    %c0_i32_1 = arith.constant 0 : i32
    return %c0_i32, %c0_i32_0 : i32, i32
  }
  func.func @transform_2(%arg0: i32) -> (i32, i32) {
    %c0_i32 = arith.constant 0 : i32
    %c0_i32_0 = arith.constant 0 : i32
    %c0_i32_1 = arith.constant 0 : i32
    return %c0_i32, %c0_i32_0 : i32, i32
  }
  func.func @transform_3(%arg0: i32) -> (i32, i32) {
    %c0_i32 = arith.constant 0 : i32
    %c0_i32_0 = arith.constant 0 : i32
    %c0_i32_1 = arith.constant 0 : i32
    return %c0_i32, %c0_i32_0 : i32, i32
  }
  func.func @transform_4(%arg0: i32) -> (i32, i32) {
    %c0_i32 = arith.constant 0 : i32
    %c0_i32_0 = arith.constant 0 : i32
    %c0_i32_1 = arith.constant 0 : i32
    return %c0_i32, %c0_i32_0 : i32, i32
  }
  func.func @transform_5(%arg0: i32) -> (i32, i32) {
    %c0_i32 = arith.constant 0 : i32
    %c0_i32_0 = arith.constant 0 : i32
    %c0_i32_1 = arith.constant 0 : i32
    return %c0_i32, %c0_i32_0 : i32, i32
  }
  func.func @transform_6(%arg0: i32) -> (i32, i32) {
    %c0_i32 = arith.constant 0 : i32
    %c0_i32_0 = arith.constant 0 : i32
    %c0_i32_1 = arith.constant 0 : i32
    return %c0_i32, %c0_i32_0 : i32, i32
  }
  func.func @transform_7(%arg0: i32) -> (i32, i32) {
    %c0_i32 = arith.constant 0 : i32
    %c0_i32_0 = arith.constant 0 : i32
    %c0_i32_1 = arith.constant 0 : i32
    return %c0_i32, %c0_i32_0 : i32, i32
  }
  func.func @transform_8(%arg0: i32) -> (i32, i32) {
    %c0_i32 = arith.constant 0 : i32
    %c0_i32_0 = arith.constant 0 : i32
    %c0_i32_1 = arith.constant 0 : i32
    return %c0_i32, %c0_i32_0 : i32, i32
  }
  func.func @transform_9(%arg0: i32) -> (i32, i32) {
    %c0_i32 = arith.constant 0 : i32
    %c0_i32_0 = arith.constant 0 : i32
    return %arg0, %c0_i32 : i32, i32
  }
}

</mosaic_0001>

<bundles_post_ra>
// kernel: fcn_forward.1
= control target key start
LH: loop header
LB: loop body
LE: loop exit
PB: predicated region body
PF: predicated region fallthrough
CT: control target
= control target key end

     0   :  { %14 = vsyncpa [#allocation3], 0  ;;  %vm1043_vm0 = vcmask 130048   ;;  %vm1739_vm1 = vcmask 1045504   ;;  %vm1735_vm2 = vcmask 359424   ;;  %s5895_s0 = inlined_call_operand.vmem [shape: f32[8,784], index: 0, kind: input, shape index: {}]   ;;  %s5896_s1 = inlined_call_operand.vmem [shape: bf16[784,300], index: 1, kind: input, shape index: {}]   ;;  %s5897_s2 = inlined_call_operand.vmem [shape: f32[1,300], index: 2, kind: input, shape index: {}]   ;;  %s5898_s3 = inlined_call_operand.vmem [shape: bf16[300,300], index: 3, kind: input, shape index: {}]   ;;  %s5899_s4 = inlined_call_operand.vmem [shape: f32[1,300], index: 4, kind: input, shape index: {}]   ;;  %s5900_s5 = inlined_call_operand.vmem [shape: bf16[300,300], index: 5, kind: input, shape index: {}]   ;;  %s5901_s6 = inlined_call_operand.vmem [shape: f32[1,300], index: 6, kind: input, shape index: {}]   ;;  %s5902_s7 = inlined_call_operand.vmem [shape: bf16[300,128], index: 7, kind: input, shape index: {}]   ;;  %s5903_s8 = inlined_call_operand.vmem [shape: f32[1,128], index: 8, kind: input, shape index: {}]   ;;  %s5904_s9 = inlined_call_operand.hbm [shape: f32[8,128], index: 9, kind: output, shape index: {}]  }
   0x1   :  { %v2725_v0 = vld [vmem:[%s5896_s1 + $0xa8] sm:$0xf]  ;;  %v3791_v1 = vld [vmem:[%s5896_s1 + $0xb0] sm:$0xf0]  ;;  %v2713_v12 = vld [vmem:[%s5896_s1 + $0x90] sm:$0xf] }
   0x2   :  { %v2726_v2 = vor.u32 %v3791_v1, %v2725_v0  ;;  %v2821_v3 = vld [vmem:[%s5896_s1 + $0x168] sm:$0xf]  ;;  %v3815_v4 = vld [vmem:[%s5896_s1 + $0x170] sm:$0xf0]  ;;  %v3788_v13 = vld [vmem:[%s5896_s1 + $0x98] sm:$0xf0] }
   0x3   :  { %v2917_v5 = vld [vmem:[%s5896_s1 + $0x228] sm:$0xf]  ;;  %v2822_v6 = vor.u32 %v3815_v4, %v2821_v3  ;;  %v3839_v7 = vld [vmem:[%s5896_s1 + $0x230] sm:$0xf0]  ;;  %v2809_v14 = vld [vmem:[%s5896_s1 + $0x150] sm:$0xf]  ;;  %v2714_v15 = vor.u32 %v3788_v13, %v2713_v12 }
   0x4   :  { %v3013_v8 = vld [vmem:[%s5896_s1 + $0x2e8] sm:$0xf]  ;;  %v3863_v9 = vld [vmem:[%s5896_s1 + $0x2f0] sm:$0xf0]  ;;  %1047 = vmatpush.bf16.msra.mxu0 %v2726_v2  ;;  %v2918_v10 = vor.u32 %v3839_v7, %v2917_v5  ;;  %v3812_v16 = vld [vmem:[%s5896_s1 + $0x158] sm:$0xf0] }
   0x5   :  { %v3014_v11 = vor.u32 %v3863_v9, %v3013_v8  ;;  %1061 = vmatpush.bf16.msra.mxu1 %v2822_v6  ;;  %v2905_v17 = vld [vmem:[%s5896_s1 + $0x210] sm:$0xf]  ;;  %v3836_v18 = vld [vmem:[%s5896_s1 + $0x218] sm:$0xf0]  ;;  %v2810_v19 = vor.u32 %v3812_v16, %v2809_v14  ;;  %v2701_v23 = vld [vmem:[%s5896_s1 + $0x78] sm:$0xf] }
   0x6   :  { %1075 = vmatpush.bf16.msra.mxu2 %v2918_v10  ;;  %v2906_v20 = vor.u32 %v3836_v18, %v2905_v17  ;;  %v3001_v21 = vld [vmem:[%s5896_s1 + $0x2d0] sm:$0xf]  ;;  %v3860_v22 = vld [vmem:[%s5896_s1 + $0x2d8] sm:$0xf0]  ;;  %v3785_v25 = vld [vmem:[%s5896_s1 + $0x80] sm:$0xf0] }
   0x7   :  { %1089 = vmatpush.bf16.msra.mxu3 %v3014_v11  ;;  %v3002_v24 = vor.u32 %v3860_v22, %v3001_v21  ;;  %v2797_v26 = vld [vmem:[%s5896_s1 + $0x138] sm:$0xf]  ;;  %v3809_v27 = vld [vmem:[%s5896_s1 + $0x140] sm:$0xf0]  ;;  %v2702_v28 = vor.u32 %v3785_v25, %v2701_v23  ;;  %v2689_v34 = vld [vmem:[%s5896_s1 + $0x60] sm:$0xf] }
   0x8   :  { %1048 = vmatpush.bf16.msra.mxu0 %v2714_v15  ;;  %v2893_v29 = vld [vmem:[%s5896_s1 + $0x1f8] sm:$0xf]  ;;  %v3833_v30 = vld [vmem:[%s5896_s1 + $0x200] sm:$0xf0]  ;;  %v2798_v32 = vor.u32 %v3809_v27, %v2797_v26  ;;  %v3782_v35 = vld [vmem:[%s5896_s1 + $0x68] sm:$0xf0] }
   0x9   :  { %v2989_v31 = vld [vmem:[%s5896_s1 + $0x2b8] sm:$0xf]  ;;  %1062 = vmatpush.bf16.msra.mxu1 %v2810_v19  ;;  %v3857_v33 = vld [vmem:[%s5896_s1 + $0x2c0] sm:$0xf0]  ;;  %v2894_v36 = vor.u32 %v3833_v30, %v2893_v29  ;;  %v2785_v38 = vld [vmem:[%s5896_s1 + $0x120] sm:$0xf]  ;;  %v2690_v44 = vor.u32 %v3782_v35, %v2689_v34 }
   0xa   :  { %1076 = vmatpush.bf16.msra.mxu2 %v2906_v20  ;;  %v2990_v37 = vor.u32 %v3857_v33, %v2989_v31  ;;  %v3806_v39 = vld [vmem:[%s5896_s1 + $0x128] sm:$0xf0]  ;;  %v2881_v40 = vld [vmem:[%s5896_s1 + $0x1e0] sm:$0xf]  ;;  %v2677_v46 = vld [vmem:[%s5896_s1 + $0x48] sm:$0xf] }
   0xb   :  { %1090 = vmatpush.bf16.msra.mxu3 %v3002_v24  ;;  %v3830_v41 = vld [vmem:[%s5896_s1 + $0x1e8] sm:$0xf0]  ;;  %v2977_v42 = vld [vmem:[%s5896_s1 + $0x2a0] sm:$0xf]  ;;  %v2786_v45 = vor.u32 %v3806_v39, %v2785_v38  ;;  %v3779_v47 = vld [vmem:[%s5896_s1 + $0x50] sm:$0xf0] }
   0xc   :  { %v3854_v43 = vld [vmem:[%s5896_s1 + $0x2a8] sm:$0xf0]  ;;  %1049 = vmatpush.bf16.msra.mxu0 %v2702_v28  ;;  %v2882_v48 = vor.u32 %v3830_v41, %v2881_v40  ;;  %v2773_v50 = vld [vmem:[%s5896_s1 + $0x108] sm:$0xf]  ;;  %v3803_v51 = vld [vmem:[%s5896_s1 + $0x110] sm:$0xf0]  ;;  %v2678_v56 = vor.u32 %v3779_v47, %v2677_v46 }
   0xd   :  { %1063 = vmatpush.bf16.msra.mxu1 %v2798_v32  ;;  %v2978_v49 = vor.u32 %v3854_v43, %v2977_v42  ;;  %v2869_v52 = vld [vmem:[%s5896_s1 + $0x1c8] sm:$0xf]  ;;  %v3827_v53 = vld [vmem:[%s5896_s1 + $0x1d0] sm:$0xf0]  ;;  %v2774_v57 = vor.u32 %v3803_v51, %v2773_v50  ;;  %v2665_v58 = vld [vmem:[%s5896_s1 + $0x30] sm:$0xf] }
   0xe   :  { %1077 = vmatpush.bf16.msra.mxu2 %v2894_v36  ;;  %v2965_v54 = vld [vmem:[%s5896_s1 + $0x288] sm:$0xf]  ;;  %v3851_v55 = vld [vmem:[%s5896_s1 + $0x290] sm:$0xf0]  ;;  %v3776_v59 = vld [vmem:[%s5896_s1 + $0x38] sm:$0xf0]  ;;  %v2870_v60 = vor.u32 %v3827_v53, %v2869_v52 }
   0xf   :  { %1091 = vmatpush.bf16.msra.mxu3 %v2990_v37  ;;  %v2966_v61 = vor.u32 %v3851_v55, %v2965_v54  ;;  %v2761_v62 = vld [vmem:[%s5896_s1 + $0xf0] sm:$0xf]  ;;  %v3800_v63 = vld [vmem:[%s5896_s1 + $0xf8] sm:$0xf0]  ;;  %v2666_v4 = vor.u32 %v3776_v59, %v2665_v58  ;;  %v2653_v6 = vld [vmem:[%s5896_s1 + $0x18] sm:$0xf] }
  0x10   :  { %1050 = vmatpush.bf16.msra.mxu0 %v2690_v44  ;;  %v2857_v0 = vld [vmem:[%s5896_s1 + $0x1b0] sm:$0xf]  ;;  %v3824_v1 = vld [vmem:[%s5896_s1 + $0x1b8] sm:$0xf0]  ;;  %v2762_v5 = vor.u32 %v3800_v63, %v2761_v62  ;;  %v3773_v7 = vld [vmem:[%s5896_s1 + $0x20] sm:$0xf0] }
  0x11   :  { %1064 = vmatpush.bf16.msra.mxu1 %v2786_v45  ;;  %v2953_v2 = vld [vmem:[%s5896_s1 + $0x270] sm:$0xf]  ;;  %v3848_v3 = vld [vmem:[%s5896_s1 + $0x278] sm:$0xf0]  ;;  %v2858_v8 = vor.u32 %v3824_v1, %v2857_v0  ;;  %v2749_v10 = vld [vmem:[%s5896_s1 + $0xd8] sm:$0xf]  ;;  %v2654_v16 = vor.u32 %v3773_v7, %v2653_v6 }
  0x12   :  { %1078 = vmatpush.bf16.msra.mxu2 %v2882_v48  ;;  %v2954_v9 = vor.u32 %v3848_v3, %v2953_v2  ;;  %v3797_v11 = vld [vmem:[%s5896_s1 + $0xe0] sm:$0xf0]  ;;  %v2845_v12 = vld [vmem:[%s5896_s1 + $0x198] sm:$0xf]  ;;  %v2641_v17 = vld [vmem:[%s5896_s1] sm:$0xf] }
  0x13   :  { %1092 = vmatpush.bf16.msra.mxu3 %v2978_v49  ;;  %v3821_v13 = vld [vmem:[%s5896_s1 + $0x1a0] sm:$0xf0]  ;;  %v2941_v14 = vld [vmem:[%s5896_s1 + $0x258] sm:$0xf]  ;;  %v3770_v18 = vld [vmem:[%s5896_s1 + $0x8] sm:$0xf0]  ;;  %v2750_v19 = vor.u32 %v3797_v11, %v2749_v10 }
  0x14   :  { %1051 = vmatpush.bf16.msra.mxu0 %v2678_v56  ;;  %v3845_v15 = vld [vmem:[%s5896_s1 + $0x260] sm:$0xf0]  ;;  %v2737_v20 = vld [vmem:[%s5896_s1 + $0xc0] sm:$0xf]  ;;  %v3794_v21 = vld [vmem:[%s5896_s1 + $0xc8] sm:$0xf0]  ;;  %v2846_v23 = vor.u32 %v3821_v13, %v2845_v12  ;;  %v2642_v31 = vor.u32 %v3770_v18, %v2641_v17 }
  0x15   :  { %1065 = vmatpush.bf16.msra.mxu1 %v2774_v57  ;;  %v2833_v22 = vld [vmem:[%s5896_s1 + $0x180] sm:$0xf]  ;;  %v2942_v24 = vor.u32 %v3845_v15, %v2941_v14  ;;  %v3818_v25 = vld [vmem:[%s5896_s1 + $0x188] sm:$0xf0]  ;;  %v3109_v26 = vld [vmem:[%s5896_s1 + $0x3a8] sm:$0xf]  ;;  %v2738_v35 = vor.u32 %v3794_v21, %v2737_v20 }
  0x16   :  { %1079 = vmatpush.bf16.msra.mxu2 %v2870_v60  ;;  %v3887_v27 = vld [vmem:[%s5896_s1 + $0x3b0] sm:$0xf0]  ;;  %v2929_v28 = vld [vmem:[%s5896_s1 + $0x240] sm:$0xf]  ;;  %v3842_v29 = vld [vmem:[%s5896_s1 + $0x248] sm:$0xf0]  ;;  %v2834_v40 = vor.u32 %v3818_v25, %v2833_v22 }
  0x17   :  { %1093 = vmatpush.bf16.msra.mxu3 %v2966_v61  ;;  %v3205_v30 = vld [vmem:[%s5896_s1 + $0x468] sm:$0xf]  ;;  %v3911_v32 = vld [vmem:[%s5896_s1 + $0x470] sm:$0xf0]  ;;  %v3790_v33 = vld [vmem:[%s5896_s1 + $0xac] sm:$0xf]  ;;  %v3110_v36 = vor.u32 %v3887_v27, %v3109_v26  ;;  %v2930_v41 = vor.u32 %v3842_v29, %v2929_v28 }
  0x18   :  { %1052 = vmatpush.bf16.msra.mxu0 %v2666_v4  ;;  %v2727_v34 = vld [vmem:[%s5896_s1 + $0xb4] sm:$0xf0]  ;;  %v3217_v37 = vld [vmem:[%s5896_s1 + $0x480] sm:$0xf]  ;;  %v3914_v38 = vld [vmem:[%s5896_s1 + $0x488] sm:$0xf0]  ;;  %v3206_v45 = vor.u32 %v3911_v32, %v3205_v30 }
  0x19   :  { %1066 = vmatpush.bf16.msra.mxu1 %v2762_v5  ;;  %v36_v39 = vld [vmem:[%s5895_s0 + $0x10] sm:$0xff]  ;;  %v43_v42 = vld [vmem:[%s5895_s0 + $0x48] sm:$0xff]  ;;  %v3884_v44 = vld [vmem:[%s5896_s1 + $0x398] sm:$0xf0]  ;;  %v2730_v46 = vor.u32 %v3790_v33, %v2727_v34  ;;  %v3218_v50 = vor.u32 %v3914_v38, %v3217_v37 }
  0x1a   :  { %1080 = vmatpush.bf16.msra.mxu2 %v2858_v8  ;;  %v3097_v43 = vld [vmem:[%s5896_s1 + $0x390] sm:$0xf]  ;;  %v3814_v47 = vld [vmem:[%s5896_s1 + $0x16c] sm:$0xf]  ;;  %v2823_v48 = vld [vmem:[%s5896_s1 + $0x174] sm:$0xf0]  ;;  %v4378_v54 = vpack.c.bf16 %v43_v42, %v36_v39 }
  0x1b   :  { %1094 = vmatpush.bf16.msra.mxu3 %v2954_v9  ;;  %v3193_v49 = vld [vmem:[%s5896_s1 + $0x450] sm:$0xf]  ;;  %v3908_v51 = vld [vmem:[%s5896_s1 + $0x458] sm:$0xf0]  ;;  %v3787_v52 = vld [vmem:[%s5896_s1 + $0x94] sm:$0xf]  ;;  %v3098_v55 = vor.u32 %v3884_v44, %v3097_v43  ;;  %v2826_v57 = vor.u32 %v3814_v47, %v2823_v48 }
  0x1c   :  { %1053 = vmatpush.bf16.msra.mxu0 %v2654_v16  ;;  %v2715_v53 = vld [vmem:[%s5896_s1 + $0x9c] sm:$0xf0]  ;;  %v3085_v56 = vld [vmem:[%s5896_s1 + $0x378] sm:$0xf]  ;;  %v3881_v58 = vld [vmem:[%s5896_s1 + $0x380] sm:$0xf0]  ;;  %v3194_v61 = vor.u32 %v3908_v51, %v3193_v49 }
  0x1d   :  { %1067 = vmatpush.bf16.msra.mxu1 %v2750_v19  ;;  %v34_v59 = vld [vmem:[%s5895_s0] sm:$0xff]  ;;  %v41_v60 = vld [vmem:[%s5895_s0 + $0x38] sm:$0xff]  ;;  %v2718_v62 = vor.u32 %v3787_v52, %v2715_v53  ;;  %v3811_v63 = vld [vmem:[%s5896_s1 + $0x154] sm:$0xf]  ;;  %v3086_v6 = vor.u32 %v3881_v58, %v3085_v56 }
  0x1e   :  { %1081 = vmatpush.bf16.msra.mxu2 %v2846_v23  ;;  %v2811_v0 = vld [vmem:[%s5896_s1 + $0x15c] sm:$0xf0]  ;;  %v3181_v1 = vld [vmem:[%s5896_s1 + $0x438] sm:$0xf]  ;;  %v4401_v2 = vpack.c.bf16 %v41_v60, %v34_v59  ;;  %v3905_v3 = vld [vmem:[%s5896_s1 + $0x440] sm:$0xf0] }
  0x1f   :  { %1095 = vmatpush.bf16.msra.mxu3 %v2942_v24  ;;  %v3784_v4 = vld [vmem:[%s5896_s1 + $0x7c] sm:$0xf]  ;;  %v2703_v5 = vld [vmem:[%s5896_s1 + $0x84] sm:$0xf0]  ;;  %v3073_v7 = vld [vmem:[%s5896_s1 + $0x360] sm:$0xf]  ;;  %v2814_v10 = vor.u32 %v3811_v63, %v2811_v0  ;;  %v3182_v15 = vor.u32 %v3905_v3, %v3181_v1 }
  0x20   :  { %1054 = vmatpush.bf16.msra.mxu0 %v2642_v31  ;;  %v35_v8 = vld [vmem:[%s5895_s0 + $0x8] sm:$0xff]  ;;  %v42_v9 = vld [vmem:[%s5895_s0 + $0x40] sm:$0xff]  ;;  %v37_v13 = vld [vmem:[%s5895_s0 + $0x18] sm:$0xff]  ;;  %v2706_v16 = vor.u32 %v3784_v4, %v2703_v5 }
  0x21   :  { %1068 = vmatpush.bf16.msra.mxu1 %v2738_v35  ;;  %v3878_v11 = vld [vmem:[%s5896_s1 + $0x368] sm:$0xf0]  ;;  %v4426_v12 = vpack.c.bf16 %v42_v9, %v35_v8  ;;  %v44_v14 = vld [vmem:[%s5895_s0 + $0x50] sm:$0xff]  ;;  %v3808_v17 = vld [vmem:[%s5896_s1 + $0x13c] sm:$0xf] }
  0x22   :  { %1082 = vmatpush.bf16.msra.mxu2 %v2834_v40  ;;  %v2799_v18 = vld [vmem:[%s5896_s1 + $0x144] sm:$0xf0]  ;;  %v3169_v19 = vld [vmem:[%s5896_s1 + $0x420] sm:$0xf]  ;;  %v4443_v20 = vpack.c.bf16 %v44_v14, %v37_v13  ;;  %v3902_v21 = vld [vmem:[%s5896_s1 + $0x428] sm:$0xf0]  ;;  %v3074_v24 = vor.u32 %v3878_v11, %v3073_v7 }
  0x23   :  { %1096 = vmatpush.bf16.msra.mxu3 %v2930_v41  ;;  %1055 = vmatmul.bf16.vlgmr.msra.gmra.mxu0 %v4401_v2  ;;  %v3781_v22 = vld [vmem:[%s5896_s1 + $0x64] sm:$0xf]  ;;  %v2691_v23 = vld [vmem:[%s5896_s1 + $0x6c] sm:$0xf0]  ;;  %v2802_v25 = vor.u32 %v3808_v17, %v2799_v18  ;;  %v3061_v26 = vld [vmem:[%s5896_s1 + $0x348] sm:$0xf]  ;;  %v3170_v28 = vor.u32 %v3902_v21, %v3169_v19 }
  0x24   :  { %1103 = vmatpush.bf16.msrb.mxu0 %v3110_v36  ;;  %1069 = vmatmul.bf16.vlgmr.msra.gmra.mxu1 %v4426_v12  ;;  %v3875_v27 = vld [vmem:[%s5896_s1 + $0x350] sm:$0xf0]  ;;  %v2694_v29 = vor.u32 %v3781_v22, %v2691_v23  ;;  %v3805_v30 = vld [vmem:[%s5896_s1 + $0x124] sm:$0xf]  ;;  %v2787_v31 = vld [vmem:[%s5896_s1 + $0x12c] sm:$0xf0] }
  0x25   :  { %1117 = vmatpush.bf16.msrb.mxu1 %v3206_v45  ;;  %1083 = vmatmul.bf16.vlgmr.msra.gmra.mxu2 %v4378_v54  ;;  %v3157_v32 = vld [vmem:[%s5896_s1 + $0x408] sm:$0xf]  ;;  %v3899_v33 = vld [vmem:[%s5896_s1 + $0x410] sm:$0xf0]  ;;  %v3778_v34 = vld [vmem:[%s5896_s1 + $0x4c] sm:$0xf]  ;;  %v3062_v36 = vor.u32 %v3875_v27, %v3061_v26  ;;  %v2790_v38 = vor.u32 %v3805_v30, %v2787_v31 }
  0x26   :  { %1138 = vmatpush.bf16.msrb.mxu2 %v3218_v50  ;;  %1097 = vmatmul.bf16.vlgmr.msra.gmra.mxu3 %v4443_v20  ;;  %v2679_v35 = vld [vmem:[%s5896_s1 + $0x54] sm:$0xf0]  ;;  %v3802_v37 = vld [vmem:[%s5896_s1 + $0x10c] sm:$0xf]  ;;  %v3049_v39 = vld [vmem:[%s5896_s1 + $0x330] sm:$0xf]  ;;  %v3158_v42 = vor.u32 %v3899_v33, %v3157_v32 }
  0x27   :  { %1145 = vmatpush.bf16.msrb.mxu3 %v2730_v46  ;;  %v3872_v40 = vld [vmem:[%s5896_s1 + $0x338] sm:$0xf0]  ;;  %v40_v41 = vld [vmem:[%s5895_s0 + $0x30] sm:$0xff]  ;;  %v2682_v43 = vor.u32 %v3778_v34, %v2679_v35  ;;  %v2775_v44 = vld [vmem:[%s5896_s1 + $0x114] sm:$0xf0] }
  0x28   :  { %1104 = vmatpush.bf16.msrb.mxu0 %v3098_v55  ;;  %v3145_v45 = vld [vmem:[%s5896_s1 + $0x3f0] sm:$0xf]  ;;  %v47_v46 = vld [vmem:[%s5895_s0 + $0x68] sm:$0xff]  ;;  %v3896_v47 = vld [vmem:[%s5896_s1 + $0x3f8] sm:$0xf0]  ;;  %v3050_v50 = vor.u32 %v3872_v40, %v3049_v39  ;;  %v2778_v52 = vor.u32 %v3802_v37, %v2775_v44 }
  0x29   :  { %1118 = vmatpush.bf16.msrb.mxu1 %v3194_v61  ;;  %v3775_v48 = vld [vmem:[%s5896_s1 + $0x34] sm:$0xf]  ;;  %v2667_v49 = vld [vmem:[%s5896_s1 + $0x3c] sm:$0xf0]  ;;  %v4510_v51 = vpack.c.bf16 %v47_v46, %v40_v41  ;;  %v3037_v53 = vld [vmem:[%s5896_s1 + $0x318] sm:$0xf]  ;;  %v3146_v56 = vor.u32 %v3896_v47, %v3145_v45 }
  0x2a   :  { %1159 = vmatpush.bf16.msra.mxu2 %v2826_v57  ;;  %v3869_v55 = vld [vmem:[%s5896_s1 + $0x320] sm:$0xf0]  ;;  %v2670_v57 = vor.u32 %v3775_v48, %v2667_v49  ;;  %v3799_v58 = vld [vmem:[%s5896_s1 + $0xf4] sm:$0xf]  ;;  %v2763_v59 = vld [vmem:[%s5896_s1 + $0xfc] sm:$0xf0] }
  0x2b   :  { %1146 = vmatpush.bf16.msrb.mxu3 %v2718_v62  ;;  %v3133_v60 = vld [vmem:[%s5896_s1 + $0x3d8] sm:$0xf]  ;;  %v3893_v61 = vld [vmem:[%s5896_s1 + $0x3e0] sm:$0xf0]  ;;  %v3772_v62 = vld [vmem:[%s5896_s1 + $0x1c] sm:$0xf]  ;;  %v3038_v0 = vor.u32 %v3869_v55, %v3037_v53 }
  0x2c   :  { %1105 = vmatpush.bf16.msrb.mxu0 %v3086_v6  ;;  %v2655_v63 = vld [vmem:[%s5896_s1 + $0x24] sm:$0xf0]  ;;  %v3796_v1 = vld [vmem:[%s5896_s1 + $0xdc] sm:$0xf]  ;;  %v3025_v4 = vld [vmem:[%s5896_s1 + $0x300] sm:$0xf]  ;;  %v2766_v6 = vor.u32 %v3799_v58, %v2763_v59 }
  0x2d   :  { %1119 = vmatpush.bf16.msrb.mxu1 %v3182_v15  ;;  %v2751_v3 = vld [vmem:[%s5896_s1 + $0xe4] sm:$0xf0]  ;;  %v3866_v5 = vld [vmem:[%s5896_s1 + $0x308] sm:$0xf0]  ;;  %v3121_v7 = vld [vmem:[%s5896_s1 + $0x3c0] sm:$0xf]  ;;  %v2658_v11 = vor.u32 %v3772_v62, %v2655_v63 }
  0x2e   :  { %1160 = vmatpush.bf16.msra.mxu2 %v2814_v10  ;;  %v3890_v8 = vld [vmem:[%s5896_s1 + $0x3c8] sm:$0xf0]  ;;  %v3769_v9 = vld [vmem:[%s5896_s1 + $0x4] sm:$0xf]  ;;  %v3134_v10 = vor.u32 %v3893_v61, %v3133_v60  ;;  %v2643_v13 = vld [vmem:[%s5896_s1 + $0xc] sm:$0xf0]  ;;  %v3026_v19 = vor.u32 %v3866_v5, %v3025_v4 }
  0x2f   :  { %1147 = vmatpush.bf16.msrb.mxu3 %v2706_v16  ;;  %v3838_v14 = vld [vmem:[%s5896_s1 + $0x22c] sm:$0xf]  ;;  %v2919_v15 = vld [vmem:[%s5896_s1 + $0x234] sm:$0xf0]  ;;  %v38_v22 = vld [vmem:[%s5895_s0 + $0x20] sm:$0xff]  ;;  %v2646_v30 = vor.u32 %v3769_v9, %v2643_v13 }
  0x30   :  { %1106 = vmatpush.bf16.msrb.mxu0 %v3074_v24  ;;  %v3862_v16 = vld [vmem:[%s5896_s1 + $0x2ec] sm:$0xf]  ;;  %v3015_v17 = vld [vmem:[%s5896_s1 + $0x2f4] sm:$0xf0]  ;;  %v2754_v24 = vor.u32 %v3796_v1, %v2751_v3  ;;  %v3793_v26 = vld [vmem:[%s5896_s1 + $0xc4] sm:$0xf] }
  0x31   :  { %1120 = vmatpush.bf16.msrb.mxu1 %v3170_v28  ;;  %v3886_v18 = vld [vmem:[%s5896_s1 + $0x3ac] sm:$0xf]  ;;  %v3111_v21 = vld [vmem:[%s5896_s1 + $0x3b4] sm:$0xf0]  ;;  %v2739_v27 = vld [vmem:[%s5896_s1 + $0xcc] sm:$0xf0]  ;;  %v3018_v34 = vor.u32 %v3862_v16, %v3015_v17 }
  0x32   :  { %1161 = vmatpush.bf16.msra.mxu2 %v2802_v25  ;;  %v45_v23 = vld [vmem:[%s5895_s0 + $0x58] sm:$0xff]  ;;  %v2922_v25 = vor.u32 %v3838_v14, %v2919_v15  ;;  %v3910_v28 = vld [vmem:[%s5896_s1 + $0x46c] sm:$0xf]  ;;  %v46_v33 = vld [vmem:[%s5895_s0 + $0x60] sm:$0xff]  ;;  %v3114_v35 = vor.u32 %v3886_v18, %v3111_v21 }
  0x33   :  { %1148 = vmatpush.bf16.msrb.mxu3 %v2694_v29  ;;  %v3122_v29 = vor.u32 %v3890_v8, %v3121_v7  ;;  %v3207_v31 = vld [vmem:[%s5896_s1 + $0x474] sm:$0xf0]  ;;  %v39_v32 = vld [vmem:[%s5895_s0 + $0x28] sm:$0xff]  ;;  %v2907_v37 = vld [vmem:[%s5896_s1 + $0x21c] sm:$0xf0]  ;;  %v4613_v39 = vpack.c.bf16 %v45_v23, %v38_v22 }
  0x34   :  { %1107 = vmatpush.bf16.msrb.mxu0 %v3062_v36  ;;  %v3835_v36 = vld [vmem:[%s5896_s1 + $0x214] sm:$0xf]  ;;  %v3003_v40 = vld [vmem:[%s5896_s1 + $0x2dc] sm:$0xf0]  ;;  %v4624_v44 = vpack.c.bf16 %v46_v33, %v39_v32  ;;  %v3210_v45 = vor.u32 %v3910_v28, %v3207_v31  ;;  %v2895_v53 = vld [vmem:[%s5896_s1 + $0x204] sm:$0xf0] }
  0x35   :  { %1121 = vmatpush.bf16.msrb.mxu1 %v3158_v42  ;;  %3227 = vmatmul.msk.bf16.vlgmr.msrb.gmra.mxu2 %vm1043_vm0, %v4510_v51  ;;  %v3883_v41 = vld [vmem:[%s5896_s1 + $0x394] sm:$0xf]  ;;  %v3099_v42 = vld [vmem:[%s5896_s1 + $0x39c] sm:$0xf0]  ;;  %v2910_v46 = vor.u32 %v3835_v36, %v2907_v37  ;;  %v3856_v55 = vld [vmem:[%s5896_s1 + $0x2bc] sm:$0xf] }
  0x36   :  { %1162 = vmatpush.bf16.msra.mxu2 %v2790_v38  ;;  %v3859_v38 = vld [vmem:[%s5896_s1 + $0x2d4] sm:$0xf]  ;;  %v3195_v48 = vld [vmem:[%s5896_s1 + $0x45c] sm:$0xf0]  ;;  %v3087_v58 = vld [vmem:[%s5896_s1 + $0x384] sm:$0xf0] }
  0x37   :  { %1149 = vmatpush.bf16.msrb.mxu3 %v2682_v43  ;;  %v2742_v43 = vor.u32 %v3793_v26, %v2739_v27  ;;  %v3907_v47 = vld [vmem:[%s5896_s1 + $0x454] sm:$0xf]  ;;  %v3006_v49 = vor.u32 %v3859_v38, %v3003_v40  ;;  %v3904_v61 = vld [vmem:[%s5896_s1 + $0x43c] sm:$0xf]  ;;  %v3183_v62 = vld [vmem:[%s5896_s1 + $0x444] sm:$0xf0] }
  0x38   :  { %1108 = vmatpush.bf16.msrb.mxu0 %v3050_v50  ;;  %v3102_v50 = vor.u32 %v3883_v41, %v3099_v42  ;;  %v3198_v59 = vor.u32 %v3907_v47, %v3195_v48  ;;  %v3829_v1 = vld [vmem:[%s5896_s1 + $0x1e4] sm:$0xf]  ;;  %v2883_v3 = vld [vmem:[%s5896_s1 + $0x1ec] sm:$0xf0]  ;;  %v3186_v8 = vor.u32 %v3904_v61, %v3183_v62  ;;  %v3826_v15 = vld [vmem:[%s5896_s1 + $0x1cc] sm:$0xf] }
  0x39   :  { %1122 = vmatpush.bf16.msrb.mxu1 %v3146_v56  ;;  %v2991_v56 = vld [vmem:[%s5896_s1 + $0x2c4] sm:$0xf0]  ;;  %v3853_v4 = vld [vmem:[%s5896_s1 + $0x2a4] sm:$0xf]  ;;  %v2979_v5 = vld [vmem:[%s5896_s1 + $0x2ac] sm:$0xf0]  ;;  %v2886_v9 = vor.u32 %v3829_v1, %v2883_v3 }
  0x3a   :  { %1163 = vmatpush.bf16.msra.mxu2 %v2778_v52  ;;  %v3832_v52 = vld [vmem:[%s5896_s1 + $0x1fc] sm:$0xf]  ;;  %v2994_v63 = vor.u32 %v3856_v55, %v2991_v56  ;;  %v3075_v7 = vld [vmem:[%s5896_s1 + $0x36c] sm:$0xf0]  ;;  %v2982_v13 = vor.u32 %v3853_v4, %v2979_v5  ;;  %v2871_v16 = vld [vmem:[%s5896_s1 + $0x1d4] sm:$0xf0] }
  0x3b   :  { %1150 = vmatpush.bf16.msrb.mxu3 %v2670_v57  ;;  %v3880_v57 = vld [vmem:[%s5896_s1 + $0x37c] sm:$0xf]  ;;  %v2898_v60 = vor.u32 %v3832_v52, %v2895_v53  ;;  %v3850_v17 = vld [vmem:[%s5896_s1 + $0x28c] sm:$0xf]  ;;  %v2967_v18 = vld [vmem:[%s5896_s1 + $0x294] sm:$0xf0]  ;;  %v2874_v23 = vor.u32 %v3826_v15, %v2871_v16 }
  0x3c   :  { %1109 = vmatpush.bf16.msrb.mxu0 %v3038_v0  ;;  %v3090_v0 = vor.u32 %v3880_v57, %v3087_v58  ;;  %v3063_v21 = vld [vmem:[%s5896_s1 + $0x354] sm:$0xf0]  ;;  %v2970_v26 = vor.u32 %v3850_v17, %v2967_v18  ;;  %v3823_v28 = vld [vmem:[%s5896_s1 + $0x1b4] sm:$0xf]  ;;  %v2955_v31 = vld [vmem:[%s5896_s1 + $0x27c] sm:$0xf0] }
  0x3d   :  { %1123 = vmatpush.bf16.msrb.mxu1 %v3134_v10  ;;  %v3901_v10 = vld [vmem:[%s5896_s1 + $0x424] sm:$0xf]  ;;  %v3871_v32 = vld [vmem:[%s5896_s1 + $0x334] sm:$0xf]  ;;  %v3051_v33 = vld [vmem:[%s5896_s1 + $0x33c] sm:$0xf0] }
  0x3e   :  { %1164 = vmatpush.bf16.msra.mxu2 %v2766_v6  ;;  %v3877_v6 = vld [vmem:[%s5896_s1 + $0x364] sm:$0xf]  ;;  %v3895_v36 = vld [vmem:[%s5896_s1 + $0x3f4] sm:$0xf]  ;;  %v3147_v37 = vld [vmem:[%s5896_s1 + $0x3fc] sm:$0xf0]  ;;  %v3054_v40 = vor.u32 %v3871_v32, %v3051_v33 }
  0x3f   :  { %1151 = vmatpush.bf16.msrb.mxu3 %v2658_v11  ;;  %v3171_v11 = vld [vmem:[%s5896_s1 + $0x42c] sm:$0xf0]  ;;  %v3078_v14 = vor.u32 %v3877_v6, %v3075_v7  ;;  %v3820_v41 = vld [vmem:[%s5896_s1 + $0x19c] sm:$0xf]  ;;  %v2847_v42 = vld [vmem:[%s5896_s1 + $0x1a4] sm:$0xf0]  ;;  %v3150_v48 = vor.u32 %v3895_v36, %v3147_v37 }
  0x40   :  { %1110 = vmatpush.bf16.msrb.mxu0 %v3026_v19  ;;  %v3874_v19 = vld [vmem:[%s5896_s1 + $0x34c] sm:$0xf]  ;;  %v3174_v22 = vor.u32 %v3901_v10, %v3171_v11  ;;  %v3039_v47 = vld [vmem:[%s5896_s1 + $0x324] sm:$0xf0]  ;;  %v3817_v53 = vld [vmem:[%s5896_s1 + $0x184] sm:$0xf] }
  0x41   :  { %1124 = vmatpush.bf16.msrb.mxu1 %v3122_v29  ;;  %v3066_v27 = vor.u32 %v3874_v19, %v3063_v21  ;;  %v2859_v29 = vld [vmem:[%s5896_s1 + $0x1bc] sm:$0xf0]  ;;  %v3135_v52 = vld [vmem:[%s5896_s1 + $0x3e4] sm:$0xf0]  ;;  %v2835_v57 = vld [vmem:[%s5896_s1 + $0x18c] sm:$0xf0] }
  0x42   :  { %1165 = vmatpush.bf16.msra.mxu2 %v2754_v24  ;;  %v3898_v24 = vld [vmem:[%s5896_s1 + $0x40c] sm:$0xf]  ;;  %v3841_v58 = vld [vmem:[%s5896_s1 + $0x244] sm:$0xf]  ;;  %v3027_v61 = vld [vmem:[%s5896_s1 + $0x30c] sm:$0xf0]  ;;  %v2838_v4 = vor.u32 %v3817_v53, %v2835_v57 }
  0x43   :  { %1152 = vmatpush.bf16.msrb.mxu3 %v2646_v30  ;;  %1111 = vmatmul.bf16.vlgmr.msrb.gmra.mxu0 %v4613_v39  ;;  %v3847_v30 = vld [vmem:[%s5896_s1 + $0x274] sm:$0xf]  ;;  %v2733_v62 = vld [vmem:[%s5896_s1 + $0xb0] sm:$0xf]  ;;  %v3816_v1 = vld [vmem:[%s5896_s1 + $0x178] sm:$0xf0] }
  0x44   :  { %1173 = vmatpush.bf16.msra.mxu0 %v2922_v25  ;;  %1125 = vmatmul.bf16.vlgmr.msrb.gmra.mxu1 %v4624_v44  ;;  %v3159_v25 = vld [vmem:[%s5896_s1 + $0x414] sm:$0xf0]  ;;  %v2958_v38 = vor.u32 %v3847_v30, %v2955_v31  ;;  %v3889_v7 = vld [vmem:[%s5896_s1 + $0x3c4] sm:$0xf]  ;;  %v3219_v21 = vld [vmem:[%s5896_s1 + $0x48c] sm:$0xf0] }
  0x45   :  { %1187 = vmatpush.bf16.msra.mxu1 %v3018_v34  ;;  %v3162_v34 = vor.u32 %v3898_v24, %v3159_v25  ;;  %v2721_v11 = vld [vmem:[%s5896_s1 + $0x98] sm:$0xf]  ;;  %v3789_v15 = vld [vmem:[%s5896_s1 + $0xa0] sm:$0xf0]  ;;  %v2925_v24 = vld [vmem:[%s5896_s1 + $0x230] sm:$0xf] }
  0x46   :  { %1166 = vmatpush.bf16.msra.mxu2 %v2742_v43  ;;  %1153 = vmatmul.bf16.vlgmr.msrb.gmra.mxu3 %v4401_v2  ;;  %v3844_v43 = vld [vmem:[%s5896_s1 + $0x25c] sm:$0xf]  ;;  %v2817_v16 = vld [vmem:[%s5896_s1 + $0x158] sm:$0xf]  ;;  %v3813_v17 = vld [vmem:[%s5896_s1 + $0x160] sm:$0xf0] }
  0x47   :  { %1201 = vmatpush.bf16.msra.mxu3 %v3114_v35  ;;  %v2862_v35 = vor.u32 %v3823_v28, %v2859_v29  ;;  %v3913_v19 = vld [vmem:[%s5896_s1 + $0x484] sm:$0xf]  ;;  %v3840_v25 = vld [vmem:[%s5896_s1 + $0x238] sm:$0xf0]  ;;  %v3009_v28 = vld [vmem:[%s5896_s1 + $0x2d8] sm:$0xf] }
  0x48   :  { %1174 = vmatpush.bf16.msra.mxu0 %v2910_v46  ;;  %v3868_v46 = vld [vmem:[%s5896_s1 + $0x31c] sm:$0xf]  ;;  %v3861_v29 = vld [vmem:[%s5896_s1 + $0x2e0] sm:$0xf0]  ;;  %v3786_v30 = vld [vmem:[%s5896_s1 + $0x88] sm:$0xf0]  ;;  %v3222_v33 = vor.u32 %v3913_v19, %v3219_v21 }
  0x49   :  { %1188 = vmatpush.bf16.msra.mxu1 %v3006_v49  ;;  %1167 = vmatmul.bf16.vlgmr.msra.gmra.mxu2 %v4426_v12  ;;  %v2850_v49 = vor.u32 %v3820_v41, %v2847_v42  ;;  %v3042_v56 = vor.u32 %v3868_v46, %v3039_v47  ;;  %v2805_v31 = vld [vmem:[%s5896_s1 + $0x140] sm:$0xf]  ;;  %v3810_v32 = vld [vmem:[%s5896_s1 + $0x148] sm:$0xf0]  ;;  %v2913_v36 = vld [vmem:[%s5896_s1 + $0x218] sm:$0xf] }
  0x4a   :  { %1215 = vmatpush.bf16.msrb.mxu2 %v3210_v45  ;;  %v2943_v45 = vld [vmem:[%s5896_s1 + $0x264] sm:$0xf0]  ;;  %v3837_v37 = vld [vmem:[%s5896_s1 + $0x220] sm:$0xf0]  ;;  %v2997_v42 = vld [vmem:[%s5896_s1 + $0x2c0] sm:$0xf] }
  0x4b   :  { %1202 = vmatpush.bf16.msra.mxu3 %v3102_v50  ;;  %v3892_v50 = vld [vmem:[%s5896_s1 + $0x3dc] sm:$0xf]  ;;  %v2946_v55 = vor.u32 %v3844_v43, %v2943_v45  ;;  %v2697_v41 = vld [vmem:[%s5896_s1 + $0x68] sm:$0xf]  ;;  %v3858_v43 = vld [vmem:[%s5896_s1 + $0x2c8] sm:$0xf0] }
  0x4c   :  { %1175 = vmatpush.bf16.msra.mxu0 %v2898_v60  ;;  %v3865_v60 = vld [vmem:[%s5896_s1 + $0x304] sm:$0xf]  ;;  %v3138_v3 = vor.u32 %v3892_v50, %v3135_v52  ;;  %v3783_v45 = vld [vmem:[%s5896_s1 + $0x70] sm:$0xf0]  ;;  %v2793_v46 = vld [vmem:[%s5896_s1 + $0x128] sm:$0xf] }
  0x4d   :  { %1189 = vmatpush.bf16.msra.mxu1 %v2994_v63  ;;  %v3792_v63 = vld [vmem:[%s5896_s1 + $0xb8] sm:$0xf0]  ;;  %v3030_v6 = vor.u32 %v3865_v60, %v3027_v61  ;;  %v3807_v47 = vld [vmem:[%s5896_s1 + $0x130] sm:$0xf0]  ;;  %v2901_v50 = vld [vmem:[%s5896_s1 + $0x200] sm:$0xf]  ;;  %v2698_v53 = vor.u32 %v3783_v45, %v2697_v41 }
  0x4e   :  { %1216 = vmatpush.bf16.msrb.mxu2 %v3198_v59  ;;  %v2931_v59 = vld [vmem:[%s5896_s1 + $0x24c] sm:$0xf0]  ;;  %v3834_v52 = vld [vmem:[%s5896_s1 + $0x208] sm:$0xf0]  ;;  %v2985_v57 = vld [vmem:[%s5896_s1 + $0x2a8] sm:$0xf] }
  0x4f   :  { %1203 = vmatpush.bf16.msra.mxu3 %v3090_v0  ;;  %v2829_v0 = vld [vmem:[%s5896_s1 + $0x170] sm:$0xf]  ;;  %v2934_v5 = vor.u32 %v3841_v58, %v2931_v59  ;;  %v3855_v58 = vld [vmem:[%s5896_s1 + $0x2b0] sm:$0xf0]  ;;  %v3780_v59 = vld [vmem:[%s5896_s1 + $0x58] sm:$0xf0] }
  0x50   :  { %1176 = vmatpush.bf16.msra.mxu0 %v2886_v9  ;;  %v2734_v9 = vor.u32 %v3792_v63, %v2733_v62  ;;  %v2830_v10 = vor.u32 %v3816_v1, %v2829_v0  ;;  %v2781_v60 = vld [vmem:[%s5896_s1 + $0x110] sm:$0xf]  ;;  %v3804_v61 = vld [vmem:[%s5896_s1 + $0x118] sm:$0xf0]  ;;  %v2902_v62 = vor.u32 %v3834_v52, %v2901_v50  ;;  %v2986_v63 = vor.u32 %v3855_v58, %v2985_v57  ;;  %v2889_v0 = vld [vmem:[%s5896_s1 + $0x1e8] sm:$0xf] }
  0x51   :  { %1190 = vmatpush.bf16.msra.mxu1 %v2982_v13  ;;  %v3021_v13 = vld [vmem:[%s5896_s1 + $0x2f0] sm:$0xf]  ;;  %v3831_v1 = vld [vmem:[%s5896_s1 + $0x1f0] sm:$0xf0]  ;;  %v2961_v19 = vld [vmem:[%s5896_s1 + $0x278] sm:$0xf] }
  0x52   :  { %1217 = vmatpush.bf16.msrb.mxu2 %v3186_v8  ;;  %v3123_v8 = vld [vmem:[%s5896_s1 + $0x3cc] sm:$0xf0]  ;;  %v3849_v21 = vld [vmem:[%s5896_s1 + $0x280] sm:$0xf0]  ;;  %v3912_v41 = vld [vmem:[%s5896_s1 + $0x478] sm:$0xf0] }
  0x53   :  { %1204 = vmatpush.bf16.msra.mxu3 %v3078_v14  ;;  %v3864_v14 = vld [vmem:[%s5896_s1 + $0x2f8] sm:$0xf0]  ;;  %v3126_v18 = vor.u32 %v3889_v7, %v3123_v8  ;;  %v3777_v8 = vld [vmem:[%s5896_s1 + $0x40] sm:$0xf0]  ;;  %v2853_v45 = vld [vmem:[%s5896_s1 + $0x1a0] sm:$0xf] }
  0x54   :  { %1177 = vmatpush.bf16.msra.mxu0 %v2874_v23  ;;  %v3022_v23 = vor.u32 %v3864_v14, %v3021_v13  ;;  %v3852_v7 = vld [vmem:[%s5896_s1 + $0x298] sm:$0xf0]  ;;  %v2877_v14 = vld [vmem:[%s5896_s1 + $0x1d0] sm:$0xf]  ;;  %v3843_v50 = vld [vmem:[%s5896_s1 + $0x250] sm:$0xf0] }
  0x55   :  { %1191 = vmatpush.bf16.msra.mxu1 %v2970_v26  ;;  %v2722_v26 = vor.u32 %v3789_v15, %v2721_v11  ;;  %v2890_v11 = vor.u32 %v3831_v1, %v2889_v0  ;;  %v3828_v15 = vld [vmem:[%s5896_s1 + $0x1d8] sm:$0xf0]  ;;  %v3201_v57 = vld [vmem:[%s5896_s1 + $0x458] sm:$0xf]  ;;  %v3909_v58 = vld [vmem:[%s5896_s1 + $0x460] sm:$0xf0] }
  0x56   :  { %1218 = vmatpush.bf16.msrb.mxu2 %v3174_v22  ;;  %v2709_v22 = vld [vmem:[%s5896_s1 + $0x80] sm:$0xf]  ;;  %v3915_v0 = vld [vmem:[%s5896_s1 + $0x490] sm:$0xf0] }
  0x57   :  { %1205 = vmatpush.bf16.msra.mxu3 %v3066_v27  ;;  %v2818_v27 = vor.u32 %v3813_v17, %v2817_v16 }
  0x58   :  { %1178 = vmatpush.bf16.msra.mxu0 %v2862_v35  ;;  %v3010_v35 = vor.u32 %v3861_v29, %v3009_v28  ;;  %v2865_v28 = vld [vmem:[%s5896_s1 + $0x1b8] sm:$0xf]  ;;  %v3825_v29 = vld [vmem:[%s5896_s1 + $0x1c0] sm:$0xf0] }
  0x59   :  { %1192 = vmatpush.bf16.msra.mxu1 %v2958_v38  ;;  %v2710_v38 = vor.u32 %v3786_v30, %v2709_v22  ;;  %v3774_v22 = vld [vmem:[%s5896_s1 + $0x28] sm:$0xf0] }
  0x5a   :  { %1219 = vmatpush.bf16.msrb.mxu2 %v3162_v34  ;;  %v2926_v34 = vor.u32 %v3840_v25, %v2925_v24  ;;  %v3798_v24 = vld [vmem:[%s5896_s1 + $0xe8] sm:$0xf0]  ;;  %v2878_v25 = vor.u32 %v3828_v15, %v2877_v14  ;;  %v3879_v14 = vld [vmem:[%s5896_s1 + $0x370] sm:$0xf0] }
  0x5b   :  { %1206 = vmatpush.bf16.msra.mxu3 %v3054_v40  ;;  %v2806_v40 = vor.u32 %v3810_v32, %v2805_v31  ;;  %v3771_v32 = vld [vmem:[%s5896_s1 + $0x10] sm:$0xf0] }
  0x5c   :  { %1179 = vmatpush.bf16.msra.mxu0 %v2850_v49  ;;  %v2998_v49 = vor.u32 %v3858_v43, %v2997_v42  ;;  %v2866_v42 = vor.u32 %v3825_v29, %v2865_v28 }
  0x5d   :  { %1193 = vmatpush.bf16.msra.mxu1 %v2946_v55  ;;  %v2794_v55 = vor.u32 %v3807_v47, %v2793_v46  ;;  %v3822_v46 = vld [vmem:[%s5896_s1 + $0x1a8] sm:$0xf0] }
  0x5e   :  { %1220 = vmatpush.bf16.msrb.mxu2 %v3150_v48  ;;  %v2914_v48 = vor.u32 %v3837_v37, %v2913_v36  ;;  %v3795_v36 = vld [vmem:[%s5896_s1 + $0xd0] sm:$0xf0]  ;;  %v3117_v37 = vld [vmem:[%s5896_s1 + $0x3b0] sm:$0xf] }
  0x5f   :  { %1207 = vmatpush.bf16.msra.mxu3 %v3042_v56  ;;  %v2685_v56 = vld [vmem:[%s5896_s1 + $0x50] sm:$0xf] }
  0x60   :  { %1180 = vmatpush.bf16.msra.mxu0 %v2838_v4  ;;  %v2782_v4 = vor.u32 %v3804_v61, %v2781_v60  ;;  %v2841_v61 = vld [vmem:[%s5896_s1 + $0x188] sm:$0xf] }
  0x61   :  { %1194 = vmatpush.bf16.msra.mxu1 %v2934_v5  ;;  %v2673_v5 = vld [vmem:[%s5896_s1 + $0x38] sm:$0xf] }
  0x62   :  { %1221 = vmatpush.bf16.msrb.mxu2 %v3138_v3  ;;  %v2686_v3 = vor.u32 %v3780_v59, %v2685_v56  ;;  %v2674_v16 = vor.u32 %v3777_v8, %v2673_v5  ;;  %v3885_v56 = vld [vmem:[%s5896_s1 + $0x3a0] sm:$0xf0]  ;;  %v2854_v59 = vor.u32 %v3822_v46, %v2853_v45  ;;  %v3882_v5 = vld [vmem:[%s5896_s1 + $0x388] sm:$0xf0]  ;;  %v3891_v45 = vld [vmem:[%s5896_s1 + $0x3d0] sm:$0xf0] }
  0x63   :  { %1208 = vmatpush.bf16.msra.mxu3 %v3030_v6  ;;  %1181 = vmatmul.bf16.vlgmr.msra.gmra.mxu0 %v4378_v54  ;;  %v2973_v6 = vld [vmem:[%s5896_s1 + $0x290] sm:$0xf]  ;;  %v3937_v46 = vld [vmem:[%s5898_s3 + $0xac] sm:$0xf] }
  0x64   :  { %1195 = vmatmul.bf16.vlgmr.msra.gmra.mxu1 %v4443_v20  ;;  %1236 = vmatpush.bf16.msrb.mxu0 %v3222_v33  ;;  %v2974_v13 = vor.u32 %v3852_v7, %v2973_v6  ;;  %v2949_v33 = vld [vmem:[%s5896_s1 + $0x260] sm:$0xf]  ;;  %v3906_v7 = vld [vmem:[%s5896_s1 + $0x448] sm:$0xf0] }
  0x65   :  { %1243 = vmatpush.bf16.msrb.mxu1 %v2734_v9  ;;  %v2769_v9 = vld [vmem:[%s5896_s1 + $0xf8] sm:$0xf]  ;;  %v3189_v6 = vld [vmem:[%s5896_s1 + $0x440] sm:$0xf] }
  0x66   :  { %1209 = vmatmul.bf16.vlgmr.msra.gmra.mxu3 %v4613_v39  ;;  %1222 = vmatpush.bf16.msrb.mxu2 %v3126_v18  ;;  %v2661_v18 = vld [vmem:[%s5896_s1 + $0x20] sm:$0xf] }
  0x67   :  { %1257 = vmatpush.bf16.msrb.mxu3 %v2830_v10  ;;  %v3801_v10 = vld [vmem:[%s5896_s1 + $0x100] sm:$0xf0]  ;;  %v2662_v30 = vor.u32 %v3774_v22, %v2661_v18  ;;  %v3165_v18 = vld [vmem:[%s5896_s1 + $0x410] sm:$0xf] }
  0x68   :  { %1271 = vmatpush.bf16.msra.mxu0 %v2926_v34  ;;  %v2770_v17 = vor.u32 %v3801_v10, %v2769_v9  ;;  %v3846_v34 = vld [vmem:[%s5896_s1 + $0x268] sm:$0xf0] }
  0x69   :  { %1244 = vmatpush.bf16.msrb.mxu1 %v2722_v26  ;;  %1223 = vmatmul.bf16.vlgmr.msrb.gmra.mxu2 %v4624_v44  ;;  %v2649_v26 = vld [vmem:[%s5896_s1 + $0x8] sm:$0xf]  ;;  %v2950_v43 = vor.u32 %v3846_v34, %v2949_v33  ;;  %v3141_v33 = vld [vmem:[%s5896_s1 + $0x3e0] sm:$0xf]  ;;  %v3894_v34 = vld [vmem:[%s5896_s1 + $0x3e8] sm:$0xf0] }
  0x6a   :  { %1285 = vmatpush.bf16.msra.mxu2 %v3022_v23  ;;  %v2757_v23 = vld [vmem:[%s5896_s1 + $0xe0] sm:$0xf]  ;;  %v2650_v47 = vor.u32 %v3771_v32, %v2649_v26  ;;  %v3316_v26 = vld [vmem:[%s5898_s3 + $0xa8] sm:$0xf]  ;;  %v3870_v32 = vld [vmem:[%s5896_s1 + $0x328] sm:$0xf0] }
  0x6b   :  { %1258 = vmatpush.bf16.msrb.mxu3 %v2818_v27  ;;  %v2962_v27 = vor.u32 %v3849_v21, %v2961_v19  ;;  %v2758_v31 = vor.u32 %v3798_v24, %v2757_v23  ;;  %v3900_v19 = vld [vmem:[%s5896_s1 + $0x418] sm:$0xf0]  ;;  %v3873_v23 = vld [vmem:[%s5896_s1 + $0x340] sm:$0xf0]  ;;  %v3153_v24 = vld [vmem:[%s5896_s1 + $0x3f8] sm:$0xf] }
  0x6c   :  { %1272 = vmatpush.bf16.msra.mxu0 %v2914_v48  ;;  %v3166_v22 = vor.u32 %v3900_v19, %v3165_v18 }
  0x6d   :  { %1245 = vmatpush.bf16.msrb.mxu1 %v2710_v38  ;;  %v3888_v38 = vld [vmem:[%s5896_s1 + $0x3b8] sm:$0xf0] }
  0x6e   :  { %1286 = vmatpush.bf16.msra.mxu2 %v3010_v35  ;;  %v2745_v35 = vld [vmem:[%s5896_s1 + $0xc8] sm:$0xf]  ;;  %v3118_v52 = vor.u32 %v3888_v38, %v3117_v37 }
  0x6f   :  { %1259 = vmatpush.bf16.msrb.mxu3 %v2806_v40  ;;  %v3213_v40 = vld [vmem:[%s5896_s1 + $0x470] sm:$0xf]  ;;  %v2746_v48 = vor.u32 %v3795_v36, %v2745_v35  ;;  %v3935_v36 = vld [vmem:[%s5898_s3 + $0x98] sm:$0xf0] }
  0x70   :  { %1273 = vmatpush.bf16.msra.mxu0 %v2902_v62  ;;  %v3819_v62 = vld [vmem:[%s5896_s1 + $0x190] sm:$0xf0]  ;;  %v3304_v35 = vld [vmem:[%s5898_s3 + $0x90] sm:$0xf] }
  0x71   :  { %1246 = vmatpush.bf16.msrb.mxu1 %v2698_v53  ;;  %v3214_v53 = vor.u32 %v3912_v41, %v3213_v40  ;;  %v2842_v8 = vor.u32 %v3819_v62, %v2841_v61  ;;  %v3305_v37 = vor.u32 %v3935_v36, %v3304_v35  ;;  %v3142_v40 = vor.u32 %v3894_v34, %v3141_v33  ;;  %v3033_v41 = vld [vmem:[%s5896_s1 + $0x308] sm:$0xf]  ;;  %v3280_v61 = vld [vmem:[%s5898_s3 + $0x60] sm:$0xf]  ;;  %v3929_v62 = vld [vmem:[%s5898_s3 + $0x68] sm:$0xf0] }
  0x72   :  { %1287 = vmatpush.bf16.msra.mxu2 %v2998_v49  ;;  %v2937_v49 = vld [vmem:[%s5896_s1 + $0x248] sm:$0xf]  ;;  %v3959_v33 = vld [vmem:[%s5898_s3 + $0x158] sm:$0xf0]  ;;  %v3388_v36 = vld [vmem:[%s5898_s3 + $0x138] sm:$0xf] }
  0x73   :  { %1260 = vmatpush.bf16.msrb.mxu3 %v2794_v55  ;;  %3228 = vmatmul.msk.bf16.vlgmr.msrb.gmra.mxu0 %vm1043_vm0, %v4510_v51  ;;  %v3105_v55 = vld [vmem:[%s5896_s1 + $0x398] sm:$0xf]  ;;  %v2938_v60 = vor.u32 %v3843_v50, %v2937_v49  ;;  %v3932_v49 = vld [vmem:[%s5898_s3 + $0x80] sm:$0xf0] }
  0x74   :  { %1274 = vmatpush.bf16.msra.mxu0 %v2890_v11  ;;  %v3106_v1 = vor.u32 %v3885_v56, %v3105_v55  ;;  %v3190_v11 = vor.u32 %v3906_v7, %v3189_v6  ;;  %v3934_v56 = vld [vmem:[%s5898_s3 + $0x94] sm:$0xf]  ;;  %v3270_v6 = vld [vmem:[%s5898_s3 + $0x54] sm:$0xf0] }
  0x75   :  { %1247 = vmatpush.bf16.msrb.mxu1 %v2686_v3  ;;  %v3202_v3 = vor.u32 %v3909_v58, %v3201_v57  ;;  %v3306_v57 = vld [vmem:[%s5898_s3 + $0x9c] sm:$0xf0] }
  0x76   :  { %1288 = vmatpush.bf16.msra.mxu2 %v2986_v63  ;;  %v3225_v63 = vld [vmem:[%s5896_s1 + $0x488] sm:$0xf]  ;;  %v3309_v58 = vor.u32 %v3934_v56, %v3306_v57 }
  0x77   :  { %1261 = vmatpush.bf16.msrb.mxu3 %v2782_v4  ;;  %v3093_v4 = vld [vmem:[%s5896_s1 + $0x380] sm:$0xf]  ;;  %v3226_v9 = vor.u32 %v3915_v0, %v3225_v63  ;;  %v3928_v63 = vld [vmem:[%s5898_s3 + $0x64] sm:$0xf]  ;;  %v3281_v0 = vor.u32 %v3929_v62, %v3280_v61  ;;  %v3947_v61 = vld [vmem:[%s5898_s3 + $0xf8] sm:$0xf0] }
  0x78   :  { %1275 = vmatpush.bf16.msra.mxu0 %v2878_v25  ;;  %v3094_v10 = vor.u32 %v3882_v5, %v3093_v4  ;;  %v3897_v25 = vld [vmem:[%s5896_s1 + $0x400] sm:$0xf0]  ;;  %v3925_v4 = vld [vmem:[%s5898_s3 + $0x4c] sm:$0xf] }
  0x79   :  { %1248 = vmatpush.bf16.msrb.mxu1 %v2674_v16  ;;  %v3154_v29 = vor.u32 %v3897_v25, %v3153_v24  ;;  %v3273_v7 = vor.u32 %v3925_v4, %v3270_v6  ;;  %v3917_v24 = vld [vmem:[%s5898_s3 + $0x8] sm:$0xf0]  ;;  %v3412_v25 = vld [vmem:[%s5898_s3 + $0x168] sm:$0xf] }
  0x7a   :  { %1289 = vmatpush.bf16.msra.mxu2 %v2974_v13  ;;  %v3081_v13 = vld [vmem:[%s5896_s1 + $0x368] sm:$0xf] }
  0x7b   :  { %1262 = vmatpush.bf16.msrb.mxu3 %v2770_v17  ;;  %v3082_v15 = vor.u32 %v3879_v14, %v3081_v13  ;;  %v3876_v17 = vld [vmem:[%s5896_s1 + $0x358] sm:$0xf0]  ;;  %v3258_v13 = vld [vmem:[%s5898_s3 + $0x3c] sm:$0xf0] }
  0x7c   :  { %1276 = vmatpush.bf16.msra.mxu0 %v2866_v42  ;;  %v3867_v42 = vld [vmem:[%s5896_s1 + $0x310] sm:$0xf0]  ;;  %v5169_v14 = vld [vmem:[%s5897_s2] sm:$0x7] }
  0x7d   :  { %1249 = vmatpush.bf16.msrb.mxu1 %v2662_v30  ;;  %v3045_v30 = vld [vmem:[%s5896_s1 + $0x320] sm:$0xf]  ;;  %v3034_v50 = vor.u32 %v3867_v42, %v3033_v41 }
  0x7e   :  { %1290 = vmatpush.bf16.msra.mxu2 %v2962_v27  ;;  %v3938_v27 = vld [vmem:[%s5898_s3 + $0xb0] sm:$0xf0]  ;;  %v3046_v38 = vor.u32 %v3870_v32, %v3045_v30  ;;  %v3400_v32 = vld [vmem:[%s5898_s3 + $0x150] sm:$0xf] }
  0x7f   :  { %1263 = vmatpush.bf16.msrb.mxu3 %v2758_v31  ;;  %v3317_v31 = vor.u32 %v3938_v27, %v3316_v26  ;;  %v3962_v27 = vld [vmem:[%s5898_s3 + $0x170] sm:$0xf0]  ;;  %v3401_v35 = vor.u32 %v3959_v33, %v3400_v32 }
  0x80   :  { %1277 = vmatpush.bf16.msra.mxu0 %v2854_v59  ;;  %v3931_v59 = vld [vmem:[%s5898_s3 + $0x7c] sm:$0xf]  ;;  %v3413_v30 = vor.u32 %v3962_v27, %v3412_v25  ;;  %v3933_v27 = vld [vmem:[%s5898_s3 + $0x88] sm:$0xf0] }
  0x81   :  { %1250 = vmatpush.bf16.msrb.mxu1 %v2650_v47  ;;  %v3318_v47 = vld [vmem:[%s5898_s3 + $0xb4] sm:$0xf0] }
  0x82   :  { %1291 = vmatpush.bf16.msra.mxu2 %v2950_v43  ;;  %v3129_v43 = vld [vmem:[%s5896_s1 + $0x3c8] sm:$0xf]  ;;  %v3321_v55 = vor.u32 %v3937_v46, %v3318_v47  ;;  %v3953_v46 = vld [vmem:[%s5898_s3 + $0x128] sm:$0xf0] }
  0x83   :  { %1264 = vmatpush.bf16.msrb.mxu3 %v2746_v48  ;;  %v3292_v48 = vld [vmem:[%s5898_s3 + $0x78] sm:$0xf] }
  0x84   :  { %1251 = vmatmul.bf16.vlgmr.msrb.gmra.mxu1 %v4401_v2  ;;  %1278 = vmatpush.bf16.msra.mxu0 %v2842_v8  ;;  %v3903_v2 = vld [vmem:[%s5896_s1 + $0x430] sm:$0xf0]  ;;  %v3256_v8 = vld [vmem:[%s5898_s3 + $0x30] sm:$0xf] }
  0x85   :  { %1299 = vmatpush.bf16.msra.mxu1 %v3118_v52  ;;  %v3130_v52 = vor.u32 %v3891_v45, %v3129_v43  ;;  %v3376_v45 = vld [vmem:[%s5898_s3 + $0x120] sm:$0xf] }
  0x86   :  { %1265 = vmatmul.bf16.vlgmr.msrb.gmra.mxu3 %v4426_v12  ;;  %1292 = vmatpush.bf16.msra.mxu2 %v2938_v60  ;;  %v3177_v12 = vld [vmem:[%s5896_s1 + $0x428] sm:$0xf] }
  0x87   :  { %1313 = vmatpush.bf16.msra.mxu3 %v3214_v53  ;;  %v3178_v16 = vor.u32 %v3903_v2, %v3177_v12  ;;  %1279 = vmatmul.bf16.vlgmr.msra.gmra.mxu0 %v4378_v54  ;;  %v3057_v54 = vld [vmem:[%s5896_s1 + $0x338] sm:$0xf]  ;;  %v3293_v53 = vor.u32 %v3932_v49, %v3292_v48  ;;  %v3377_v48 = vor.u32 %v3953_v46, %v3376_v45 }
  0x88   :  { %1334 = vmatpush.bf16.msrb.mxu0 %v3226_v9  ;;  %v3058_v28 = vor.u32 %v3873_v23, %v3057_v54  ;;  %v3923_v9 = vld [vmem:[%s5898_s3 + $0x38] sm:$0xf0]  ;;  %v3244_v2 = vld [vmem:[%s5898_s3 + $0x18] sm:$0xf]  ;;  %v3232_v23 = vld [vmem:[%s5898_s3] sm:$0xf] }
  0x89   :  { %1300 = vmatpush.bf16.msra.mxu1 %v3106_v1  ;;  %1293 = vmatmul.bf16.vlgmr.msra.gmra.mxu2 %v4443_v20  ;;  %v3069_v20 = vld [vmem:[%s5896_s1 + $0x350] sm:$0xf]  ;;  %v3268_v1 = vld [vmem:[%s5898_s3 + $0x48] sm:$0xf]  ;;  %v3233_v26 = vor.u32 %v3917_v24, %v3232_v23 }
  0x8a   :  { %v3070_v21 = vor.u32 %v3876_v17, %v3069_v20  ;;  %1749 = vmatpush.bf16.msrb.mxu2 %v3317_v31  ;;  %v3246_v17 = vld [vmem:[%s5898_s3 + $0x24] sm:$0xf0] }
  0x8b   :  { %1314 = vmatpush.bf16.msra.mxu3 %v3202_v3  ;;  %v3926_v3 = vld [vmem:[%s5898_s3 + $0x50] sm:$0xf0] }
  0x8c   :  { %v3269_v5 = vor.u32 %v3926_v3, %v3268_v1  ;;  %1763 = vmatpush.bf16.msra.mxu0 %v3413_v30  ;;  %v3944_v1 = vld [vmem:[%s5898_s3 + $0xe0] sm:$0xf0]  ;;  %v3930_v30 = vld [vmem:[%s5898_s3 + $0x70] sm:$0xf0] }
  0x8d   :  { %1301 = vmatpush.bf16.msra.mxu1 %v3094_v10  ;;  %v3922_v10 = vld [vmem:[%s5898_s3 + $0x34] sm:$0xf] }
  0x8e   :  { %1750 = vmatpush.bf16.msrb.mxu2 %v3305_v37  ;;  %v3261_v12 = vor.u32 %v3922_v10, %v3258_v13  ;;  %v3956_v37 = vld [vmem:[%s5898_s3 + $0x140] sm:$0xf0]  ;;  %v3328_v10 = vld [vmem:[%s5898_s3 + $0xc0] sm:$0xf] }
  0x8f   :  { %1315 = vmatpush.bf16.msra.mxu3 %v3190_v11  ;;  %v3257_v11 = vor.u32 %v3923_v9, %v3256_v8  ;;  %v3389_v41 = vor.u32 %v3956_v37, %v3388_v36 }
  0x90   :  { %1764 = vmatpush.bf16.msra.mxu0 %v3401_v35  ;;  %v3927_v35 = vld [vmem:[%s5898_s3 + $0x58] sm:$0xf0] }
  0x91   :  { %1302 = vmatpush.bf16.msra.mxu1 %v3082_v15  ;;  %v3920_v15 = vld [vmem:[%s5898_s3 + $0x20] sm:$0xf0] }
  0x92   :  { %1751 = vmatpush.bf16.msrb.mxu2 %v3293_v53  ;;  %v3245_v20 = vor.u32 %v3920_v15, %v3244_v2  ;;  %v3950_v53 = vld [vmem:[%s5898_s3 + $0x110] sm:$0xf0]  ;;  %v3324_v15 = vld [vmem:[%s5898_s3 + $0xb0] sm:$0xf] }
  0x93   :  { %1316 = vmatpush.bf16.msra.mxu3 %v3178_v16  ;;  %v3919_v16 = vld [vmem:[%s5898_s3 + $0x1c] sm:$0xf] }
  0x94   :  { %v3249_v54 = vor.u32 %v3919_v16, %v3246_v17  ;;  %1765 = vmatpush.bf16.msra.mxu0 %v3389_v41  ;;  %v3939_v16 = vld [vmem:[%s5898_s3 + $0xb8] sm:$0xf0]  ;;  %v3264_v41 = vld [vmem:[%s5898_s3 + $0x38] sm:$0xf] }
  0x95   :  { %1303 = vmatpush.bf16.msra.mxu1 %v3070_v21  ;;  %v253_v21 = vperm.slane %v5169_v14, 0 }
  0x96   :  { %1752 = vmatpush.bf16.msrb.mxu2 %v3281_v0 }
  0x97   :  { %1317 = vmatpush.bf16.msra.mxu3 %v3166_v22  ;;  %3229 = vmatmul.msk.bf16.vlgmr.msrb.gmra.mxu0 %vm1043_vm0, %v4510_v51  ;;  %v3294_v51 = vld [vmem:[%s5898_s3 + $0x84] sm:$0xf0] }
  0x98   :  { %v3297_v60 = vor.u32 %v3931_v59, %v3294_v51  ;;  %1766 = vmatpush.bf16.msra.mxu0 %v3377_v48  ;;  %v3252_v48 = vld [vmem:[%s5898_s3 + $0x20] sm:$0xf] }
  0x99   :  { %1304 = vmatpush.bf16.msra.mxu1 %v3058_v28  ;;  %v3916_v28 = vld [vmem:[%s5898_s3 + $0x4] sm:$0xf] }
  0x9a   :  { %1753 = vmatpush.bf16.msrb.mxu2 %v3269_v5 }
  0x9b   :  { %1318 = vmatpush.bf16.msra.mxu3 %v3154_v29  ;;  %v3234_v29 = vld [vmem:[%s5898_s3 + $0xc] sm:$0xf0] }
  0x9c   :  { %v3237_v31 = vor.u32 %v3916_v28, %v3234_v29  ;;  %v3288_v29 = vld [vmem:[%s5898_s3 + $0x68] sm:$0xf] }
  0x9d   :  { %1305 = vmatpush.bf16.msra.mxu1 %v3046_v38  ;;  %v3289_v32 = vor.u32 %v3930_v30, %v3288_v29  ;;  %v3426_v30 = vld [vmem:[%s5898_s3 + $0x18c] sm:$0xf0] }
  0x9e   :  { %1754 = vmatpush.bf16.msrb.mxu2 %v3257_v11  ;;  %v3941_v11 = vld [vmem:[%s5898_s3 + $0xc8] sm:$0xf0] }
  0x9f   :  { %1319 = vmatpush.bf16.msra.mxu3 %v3142_v40  ;;  %v3329_v2 = vor.u32 %v3941_v11, %v3328_v10 }
  0xa0   :  { %v1056_v18 = vpop.f32.mrf.mxu0 }
  0xa1   :  { %1306 = vmatpush.bf16.msra.mxu1 %v3034_v50  ;;  %v1070_v22 = vpop.f32.mrf.mxu1  ;;  %v1057_v34 = vadd.f32 %v1056_v18, %v253_v21 }
  0xa2   :  { %1755 = vmatpush.bf16.msrb.mxu2 %v3245_v20  ;;  %v3325_v20 = vor.u32 %v3939_v16, %v3324_v15 }
  0xa3   :  { %1320 = vmatpush.bf16.msra.mxu3 %v3130_v52  ;;  %v1071_v42 = vadd.f32 %v1070_v22, %v1057_v34  ;;  %v3364_v52 = vld [vmem:[%s5898_s3 + $0x108] sm:$0xf]  ;;  %v3936_v22 = vld [vmem:[%s5898_s3 + $0xa0] sm:$0xf0]  ;;  %v3276_v34 = vld [vmem:[%s5898_s3 + $0x50] sm:$0xf] }
  0xa4   :  { %1307 = vmatmul.bf16.vlgmr.msra.gmra.mxu1 %v4613_v39  ;;  %v3282_v39 = vld [vmem:[%s5898_s3 + $0x6c] sm:$0xf0]  ;;  %v3365_v57 = vor.u32 %v3950_v53, %v3364_v52  ;;  %v3277_v37 = vor.u32 %v3927_v35, %v3276_v34 }
  0xa5   :  { %v3420_v35 = vld [vmem:[%s5898_s3 + $0x170] sm:$0xf] }
  0xa6   :  { %1321 = vmatmul.bf16.vlgmr.msra.gmra.mxu3 %v4624_v44  ;;  %v3285_v44 = vor.u32 %v3928_v63, %v3282_v39  ;;  %1756 = vmatpush.bf16.msrb.mxu2 %v3233_v26  ;;  %v3300_v26 = vld [vmem:[%s5898_s3 + $0x80] sm:$0xf] }
  0xa7   :  { %1791 = vmatpush.bf16.msrb.mxu3 %v3321_v55  ;;  %1767 = vmatpush.bf16.msra.mxu0 %v3365_v57  ;;  %v3301_v28 = vor.u32 %v3933_v27, %v3300_v26  ;;  %v3240_v57 = vld [vmem:[%s5898_s3 + $0x8] sm:$0xf]  ;;  %v3424_v26 = vld [vmem:[%s5898_s3 + $0x180] sm:$0xf]  ;;  %v3965_v27 = vld [vmem:[%s5898_s3 + $0x188] sm:$0xf0] }
  0xa8   :  { %v1084_v19 = vpop.f32.mrf.mxu2  ;;  %v1058_v38 = vpop.f32.mrf.mxu0  ;;  %v3425_v29 = vor.u32 %v3965_v27, %v3424_v26 }
  0xa9   :  { %v1072_v43 = vpop.f32.mrf.mxu1  ;;  %v1098_v47 = vpop.f32.mrf.mxu3  ;;  %v1085_v49 = vadd.f32 %v1084_v19, %v1071_v42  ;;  %v1059_v50 = vadd.f32 %v1058_v38, %v253_v21  ;;  %v3312_v21 = vld [vmem:[%s5898_s3 + $0x98] sm:$0xf]  ;;  %v3924_v42 = vld [vmem:[%s5898_s3 + $0x40] sm:$0xf0] }
  0xaa   :  { %v3313_v23 = vor.u32 %v3936_v22, %v3312_v21  ;;  %v3265_v45 = vor.u32 %v3924_v42, %v3264_v41  ;;  %v3967_v22 = vld [vmem:[%s5898_s3 + $0x19c] sm:$0xf]  ;;  %v3958_v41 = vld [vmem:[%s5898_s3 + $0x154] sm:$0xf]  ;;  %v3402_v42 = vld [vmem:[%s5898_s3 + $0x15c] sm:$0xf0] }
  0xab   :  { %1792 = vmatpush.bf16.msrb.mxu3 %v3309_v58  ;;  %v1073_v55 = vadd.f32 %v1072_v43, %v1059_v50  ;;  %v1099_v56 = vadd.f32 %v1098_v47, %v1085_v49  ;;  %v3921_v49 = vld [vmem:[%s5898_s3 + $0x28] sm:$0xf0] }
  0xac   :  { %v3253_v53 = vor.u32 %v3921_v49, %v3252_v48 }
  0xaf   :  { %1793 = vmatpush.bf16.msrb.mxu3 %v3297_v60  ;;  %v3352_v60 = vld [vmem:[%s5898_s3 + $0xf0] sm:$0xf] }
  0xb0   :  { %v1086_v40 = vpop.f32.mrf.mxu2  ;;  %v3353_v0 = vor.u32 %v3947_v61, %v3352_v60 }
  0xb1   :  { %v1087_v62 = vadd.f32 %v1086_v40, %v1073_v55  ;;  %v1100_v39 = vpop.f32.mrf.mxu3 }
  0xb2   :  { %1768 = vmatpush.bf16.msra.mxu0 %v3353_v0 }
  0xb3   :  { %1794 = vmatpush.bf16.msrb.mxu3 %v3285_v44  ;;  %v3340_v44 = vld [vmem:[%s5898_s3 + $0xd8] sm:$0xf]  ;;  %v1101_v3 = vadd.f32 %v1100_v39, %v1087_v62 }
  0xb4   :  { %v3341_v5 = vor.u32 %v3944_v1, %v3340_v44  ;;  %v3448_v1 = vld [vmem:[%s5898_s3 + $0x1b0] sm:$0xf] }
  0xb6   :  { %1769 = vmatpush.bf16.msra.mxu0 %v3341_v5  ;;  %v3970_v5 = vld [vmem:[%s5898_s3 + $0x1b4] sm:$0xf] }
  0xb7   :  { %1795 = vmatpush.bf16.msrb.mxu3 %v3273_v7 }
  0xb8   :  { %v1140_v59 = vpop.f32.mrf.mxu2 }
  0xba   :  { %1770 = vmatpush.bf16.msra.mxu0 %v3329_v2 }
  0xbb   :  { %1796 = vmatpush.bf16.msrb.mxu3 %v3261_v12 }
  0xbe   :  { %1833 = vmatpush.bf16.msrb.mxu0 %v3325_v20 }
  0xbf   :  { %1797 = vmatpush.bf16.msrb.mxu3 %v3249_v54 }
  0xc0   :  { %v1112_v58 = vpop.f32.mrf.mxu0  ;;  %v1142_v9 = vpop.f32.mrf.mxu2 }
  0xc1   :  { %v1126_v51 = vpop.f32.mrf.mxu1  ;;  %v1113_v63 = vadd.f32 %v1112_v58, %v1099_v56  ;;  %v3918_v58 = vld [vmem:[%s5898_s3 + $0x10] sm:$0xf0] }
  0xc2   :  { %1834 = vmatpush.bf16.msrb.mxu0 %v3313_v23  ;;  %v3241_v60 = vor.u32 %v3918_v58, %v3240_v57  ;;  %v3957_v57 = vld [vmem:[%s5898_s3 + $0x148] sm:$0xf0]  ;;  %v3444_v58 = vld [vmem:[%s5898_s3 + $0x1a0] sm:$0xf] }
  0xc3   :  { %1798 = vmatpush.bf16.msrb.mxu3 %v3237_v31  ;;  %v1127_v4 = vadd.f32 %v1126_v51, %v1113_v63  ;;  %v254_v31 = vperm.slane %v5169_v14, 1 }
  0xc5   :  { %v1141_v13 = vadd.f32 %v1140_v59, %v1127_v4 }
  0xc6   :  { %1835 = vmatpush.bf16.msrb.mxu0 %v3301_v28  ;;  %v3964_v28 = vld [vmem:[%s5898_s3 + $0x184] sm:$0xf] }
  0xc7   :  { %v1341_v18 = vmax.f32 %v1141_v13, 0.0 }
  0xc8   :  { %v1114_v6 = vpop.f32.mrf.mxu0 }
  0xc9   :  { %v1115_v7 = vadd.f32 %v1114_v6, %v1101_v3  ;;  %v1128_v8 = vpop.f32.mrf.mxu1  ;;  %v1154_v54 = vpop.f32.mrf.mxu3  ;;  %v3971_v3 = vld [vmem:[%s5898_s3 + $0x1b8] sm:$0x30]  ;;  %v3450_v6 = vld [vmem:[%s5898_s3 + $0x1bc] sm:$0x30] }
  0xca   :  { %v1155_v36 = vadd.f32 %v1154_v54, %v254_v31  ;;  %1836 = vmatpush.bf16.msrb.mxu0 %v3289_v32  ;;  %v3449_v4 = vor.u32 %v3971_v3, %v3448_v1  ;;  %v3438_v54 = vld [vmem:[%s5898_s3 + $0x1a4] sm:$0xf0]  ;;  %v3414_v32 = vld [vmem:[%s5898_s3 + $0x174] sm:$0xf0]  ;;  %v3966_v3 = vld [vmem:[%s5898_s3 + $0x190] sm:$0xf0] }
  0xcb   :  { %v1129_v12 = vadd.f32 %v1128_v8, %v1115_v7  ;;  %v3432_v1 = vld [vmem:[%s5898_s3 + $0x188] sm:$0xf] }
  0xcc   :  { %v1168_v25 = vpop.f32.mrf.mxu2  ;;  %v1741_v11 = vsel %vm1739_vm1, %v3449_v4, 0 }
  0xcd   :  { %v1143_v17 = vadd.f32 %v1142_v9, %v1129_v12  ;;  %v1169_v43 = vadd.f32 %v1168_v25, %v1155_v36  ;;  %v3453_v9 = vor.u32 %v3970_v5, %v3450_v6  ;;  %1782 = vmatpush.bf16.msrb.mxu1 %v1741_v11  ;;  %v3441_v25 = vor.u32 %v3967_v22, %v3438_v54  ;;  %v3963_v36 = vld [vmem:[%s5898_s3 + $0x178] sm:$0xf0]  ;;  %v3348_v22 = vld [vmem:[%s5898_s3 + $0xe0] sm:$0xf]  ;;  %v3945_v54 = vld [vmem:[%s5898_s3 + $0xe8] sm:$0xf0] }
  0xce   :  { %1837 = vmatpush.bf16.msrb.mxu0 %v3277_v37  ;;  %v3421_v37 = vor.u32 %v3963_v36, %v3420_v35  ;;  %v3433_v5 = vor.u32 %v3966_v3, %v3432_v1  ;;  %v3942_v35 = vld [vmem:[%s5898_s3 + $0xd0] sm:$0xf0]  ;;  %v3992_v1 = vld [vmem:[%s5900_s5 + $0x98] sm:$0xf0] }
  0xcf   :  { %v1344_v19 = vmax.f32 %v1143_v17, 0.0  ;;  %v1744_v13 = vsel %vm1739_vm1, %v3453_v9, 0  ;;  %v3372_v9 = vld [vmem:[%s5898_s3 + $0x110] sm:$0xf] }
  0xd0   :  { %1824 = vmatpush.bf16.msra.mxu2 %v1744_v13 }
  0xd1   :  { %v5256_v24 = vpack.c.bf16 %v1344_v19, %v1341_v18  ;;  %v1156_v33 = vpop.f32.mrf.mxu3  ;;  %v3436_v18 = vld [vmem:[%s5898_s3 + $0x198] sm:$0xf]  ;;  %v3968_v19 = vld [vmem:[%s5898_s3 + $0x1a0] sm:$0xf0] }
  0xd2   :  { %v1157_v47 = vadd.f32 %v1156_v33, %v254_v31  ;;  %1838 = vmatpush.bf16.msrb.mxu0 %v3265_v45  ;;  %v3437_v21 = vor.u32 %v3968_v19, %v3436_v18  ;;  %v3961_v31 = vld [vmem:[%s5898_s3 + $0x16c] sm:$0xf]  ;;  %v3429_v33 = vor.u32 %v3964_v28, %v3426_v30  ;;  %v3943_v18 = vld [vmem:[%s5898_s3 + $0xdc] sm:$0xf]  ;;  %v3342_v19 = vld [vmem:[%s5898_s3 + $0xe4] sm:$0xf0] }
  0xd3   :  { %1757 = vmatmul.bf16.vlgmr.msrb.gmra.mxu2 %v5256_v24  ;;  %1799 = vmatmul.bf16.vlgmr.msrb.gmra.mxu3 %v5256_v24  ;;  %v3417_v34 = vor.u32 %v3961_v31, %v3414_v32  ;;  %v3345_v26 = vor.u32 %v3943_v18, %v3342_v19  ;;  %v3940_v30 = vld [vmem:[%s5898_s3 + $0xc4] sm:$0xf]  ;;  %v3330_v31 = vld [vmem:[%s5898_s3 + $0xcc] sm:$0xf0]  ;;  %v3511_v19 = vld [vmem:[%s5900_s5 + $0x60] sm:$0xf] }
  0xd4   :  { %v1170_v40 = vpop.f32.mrf.mxu2  ;;  %1783 = vmatpush.bf16.msrb.mxu1 %v3437_v21  ;;  %1825 = vmatpush.bf16.msra.mxu2 %v3441_v25 }
  0xd5   :  { %v1171_v56 = vadd.f32 %v1170_v40, %v1157_v47  ;;  %v3972_v40 = vld [vmem:[%s5898_s3 + $0x1c0] sm:$0x30] }
  0xd6   :  { %1839 = vmatpush.bf16.msrb.mxu0 %v3253_v53  ;;  %v3960_v47 = vld [vmem:[%s5898_s3 + $0x160] sm:$0xf0]  ;;  %v3396_v53 = vld [vmem:[%s5898_s3 + $0x140] sm:$0xf] }
  0xd8   :  { %1784 = vmatpush.bf16.msrb.mxu1 %v3425_v29  ;;  %1826 = vmatpush.bf16.msra.mxu2 %v3429_v33  ;;  %v3349_v29 = vor.u32 %v3945_v54, %v3348_v22  ;;  %v3985_v22 = vld [vmem:[%s5900_s5 + $0x64] sm:$0xf]  ;;  %v3513_v54 = vld [vmem:[%s5900_s5 + $0x6c] sm:$0xf0] }
  0xda   :  { %1840 = vmatpush.bf16.msrb.mxu0 %v3241_v60 }
  0xdc   :  { %1805 = vmatpush.bf16.msra.mxu1 %v3417_v34  ;;  %1847 = vmatpush.bf16.msrb.mxu2 %v3421_v37  ;;  %v3336_v34 = vld [vmem:[%s5898_s3 + $0xc8] sm:$0xf]  ;;  %v3333_v37 = vor.u32 %v3940_v30, %v3330_v31  ;;  %v3982_v30 = vld [vmem:[%s5900_s5 + $0x4c] sm:$0xf] }
  0xe0   :  { %v1182_v38 = vpop.f32.mrf.mxu0 }
  0xe1   :  { %v1196_v46 = vpop.f32.mrf.mxu1  ;;  %v1183_v50 = vadd.f32 %v1182_v38, %v1169_v43  ;;  %v3456_v38 = vld [vmem:[%s5898_s3 + $0x1b8] sm:$0xf] }
  0xe2   :  { %v3408_v43 = vld [vmem:[%s5898_s3 + $0x158] sm:$0xf]  ;;  %v3457_v45 = vor.u32 %v3972_v40, %v3456_v38  ;;  %v3337_v38 = vor.u32 %v3942_v35, %v3336_v34  ;;  %v4010_v34 = vld [vmem:[%s5900_s5 + $0x128] sm:$0xf0] }
  0xe3   :  { %v1197_v51 = vadd.f32 %v1196_v46, %v1183_v50  ;;  %v3405_v46 = vor.u32 %v3958_v41, %v3402_v42  ;;  %v3409_v48 = vor.u32 %v3960_v47, %v3408_v43  ;;  %v3955_v50 = vld [vmem:[%s5898_s3 + $0x13c] sm:$0xf] }
  0xe4   :  { %v1747_v49 = vsel %vm1739_vm1, %v3457_v45, 0 }
  0xe5   :  { %1806 = vmatpush.bf16.msra.mxu1 %v3405_v46  ;;  %1866 = vmatpush.bf16.msra.mxu3 %v1747_v49 }
  0xe6   :  { %1848 = vmatpush.bf16.msrb.mxu2 %v3409_v48 }
  0xe8   :  { %v1184_v55 = vpop.f32.mrf.mxu0 }
  0xe9   :  { %v1210_v52 = vpop.f32.mrf.mxu3  ;;  %v1185_v61 = vadd.f32 %v1184_v55, %v1171_v56  ;;  %v1198_v62 = vpop.f32.mrf.mxu1 }
  0xea   :  { %v1211_v63 = vadd.f32 %v1210_v52, %v1197_v51  ;;  %v3390_v52 = vld [vmem:[%s5898_s3 + $0x144] sm:$0xf0]  ;;  %v3397_v51 = vor.u32 %v3957_v57, %v3396_v53 }
  0xeb   :  { %v1199_v44 = vadd.f32 %v1198_v62, %v1185_v61  ;;  %v3393_v56 = vor.u32 %v3955_v50, %v3390_v52  ;;  %v3952_v61 = vld [vmem:[%s5898_s3 + $0x124] sm:$0xf]  ;;  %v3378_v62 = vld [vmem:[%s5898_s3 + $0x12c] sm:$0xf0] }
  0xec   :  { %v1224_v59 = vpop.f32.mrf.mxu2  ;;  %1849 = vmatpush.bf16.msrb.mxu2 %v3397_v51 }
  0xed   :  { %v1225_v7 = vadd.f32 %v1224_v59, %v1211_v63  ;;  %v3969_v59 = vld [vmem:[%s5898_s3 + $0x1a8] sm:$0xf0]  ;;  %1807 = vmatpush.bf16.msra.mxu1 %v3393_v56  ;;  %v3384_v63 = vld [vmem:[%s5898_s3 + $0x128] sm:$0xf] }
  0xee   :  { %v3445_v60 = vor.u32 %v3969_v59, %v3444_v58 }
  0xf0   :  { %v1238_v39 = vpop.f32.mrf.mxu0  ;;  %1867 = vmatpush.bf16.msra.mxu3 %v3445_v60 }
  0xf1   :  { %v1212_v0 = vpop.f32.mrf.mxu3  ;;  %v1239_v12 = vadd.f32 %v1238_v39, %v1225_v7  ;;  %v3381_v39 = vor.u32 %v3952_v61, %v3378_v62  ;;  %v3949_v7 = vld [vmem:[%s5898_s3 + $0x10c] sm:$0xf]  ;;  %v3547_v62 = vld [vmem:[%s5900_s5 + $0xa8] sm:$0xf] }
  0xf2   :  { %v1213_v8 = vadd.f32 %v1212_v0, %v1199_v44  ;;  %v3954_v44 = vld [vmem:[%s5898_s3 + $0x130] sm:$0xf0] }
  0xf3   :  { %v1342_v20 = vmax.f32 %v1239_v12, 0.0  ;;  %v3385_v4 = vor.u32 %v3954_v44, %v3384_v63  ;;  %1808 = vmatpush.bf16.msra.mxu1 %v3381_v39  ;;  %v3995_v63 = vld [vmem:[%s5900_s5 + $0xb0] sm:$0xf0]  ;;  %v3549_v44 = vld [vmem:[%s5900_s5 + $0xb4] sm:$0xf0] }
  0xf4   :  { %v1226_v10 = vpop.f32.mrf.mxu2  ;;  %1868 = vmatpush.bf16.msra.mxu3 %v3433_v5  ;;  %v3548_v39 = vor.u32 %v3995_v63, %v3547_v62  ;;  %v3537_v5 = vld [vmem:[%s5900_s5 + $0x9c] sm:$0xf0]  ;;  %v3465_v62 = vld [vmem:[%s5900_s5 + $0xc] sm:$0xf0]  ;;  %v3571_v63 = vld [vmem:[%s5900_s5 + $0xd8] sm:$0xf] }
  0xf5   :  { %v1227_v2 = vadd.f32 %v1226_v10, %v1213_v8  ;;  %1850 = vmatpush.bf16.msrb.mxu2 %v3385_v4  ;;  %v3366_v8 = vld [vmem:[%s5898_s3 + $0x114] sm:$0xf0]  ;;  %v255_v10 = vperm.slane %v5169_v14, 2  ;;  %v3991_v4 = vld [vmem:[%s5900_s5 + $0x94] sm:$0xf] }
  0xf6   :  { %v3369_v11 = vor.u32 %v3949_v7, %v3366_v8  ;;  %v4019_v8 = vld [vmem:[%s5900_s5 + $0x170] sm:$0xf0] }
  0xf8   :  { %v1240_v15 = vpop.f32.mrf.mxu0  ;;  %1809 = vmatpush.bf16.msra.mxu1 %v3369_v11  ;;  %v3523_v11 = vld [vmem:[%s5900_s5 + $0x78] sm:$0xf] }
  0xf9   :  { %v1241_v16 = vadd.f32 %v1240_v15, %v1227_v2  ;;  %v3946_v2 = vld [vmem:[%s5898_s3 + $0xf4] sm:$0xf]  ;;  %v3354_v15 = vld [vmem:[%s5898_s3 + $0xfc] sm:$0xf0] }
  0xfa   :  { %v3357_v14 = vor.u32 %v3946_v2, %v3354_v15  ;;  %v3525_v2 = vld [vmem:[%s5900_s5 + $0x84] sm:$0xf0]  ;;  %v4016_v15 = vld [vmem:[%s5900_s5 + $0x158] sm:$0xf0] }
  0xfb   :  { %v1345_v17 = vmax.f32 %v1241_v16, 0.0  ;;  %v3360_v16 = vld [vmem:[%s5898_s3 + $0xf8] sm:$0xf] }
  0xfc   :  { %1810 = vmatpush.bf16.msra.mxu1 %v3357_v14 }
  0xfd   :  { %v5323_v23 = vpack.c.bf16 %v1345_v17, %v1342_v20  ;;  %v3948_v20 = vld [vmem:[%s5898_s3 + $0x100] sm:$0xf0] }
  0xfe   :  { %v3361_v17 = vor.u32 %v3948_v20, %v3360_v16  ;;  %v3619_v20 = vld [vmem:[%s5900_s5 + $0x138] sm:$0xf] }
  0xff   :  { %1771 = vmatmul.bf16.vlgmr.msra.gmra.mxu0 %v5323_v23 }
 0x100   :  { %1811 = vmatpush.bf16.msra.mxu1 %v3345_v26 }
 0x101   :  { %v1252_v55 = vpop.f32.mrf.mxu1 }
 0x102   :  { %v1253_v21 = vadd.f32 %v1252_v55, %v255_v10 }
 0x104   :  { %v1280_v0 = vpop.f32.mrf.mxu0  ;;  %1812 = vmatpush.bf16.msra.mxu1 %v3333_v37  ;;  %v3487_v37 = vld [vmem:[%s5900_s5 + $0x30] sm:$0xf] }
 0x109   :  { %v1266_v6 = vpop.f32.mrf.mxu3  ;;  %v1254_v13 = vpop.f32.mrf.mxu1 }
 0x10a   :  { %v1267_v32 = vadd.f32 %v1266_v6, %v1253_v21  ;;  %v1255_v33 = vadd.f32 %v1254_v13, %v255_v10  ;;  %v3643_v6 = vld [vmem:[%s5900_s5 + $0x168] sm:$0xf]  ;;  %v3631_v13 = vld [vmem:[%s5900_s5 + $0x150] sm:$0xf]  ;;  %v3986_v21 = vld [vmem:[%s5900_s5 + $0x68] sm:$0xf0] }
 0x10b   :  { %v3644_v10 = vor.u32 %v4019_v8, %v3643_v6  ;;  %v3632_v16 = vor.u32 %v4016_v15, %v3631_v13  ;;  %v3512_v26 = vor.u32 %v3986_v21, %v3511_v19  ;;  %v3559_v8 = vld [vmem:[%s5900_s5 + $0xc0] sm:$0xf]  ;;  %v3996_v13 = vld [vmem:[%s5900_s5 + $0xb8] sm:$0xf0]  ;;  %v4025_v15 = vld [vmem:[%s5900_s5 + $0x1a0] sm:$0xf0] }
 0x10c   :  { %v1282_v25 = vpop.f32.mrf.mxu0  ;;  %v1294_v27 = vpop.f32.mrf.mxu2  ;;  %v1281_v40 = vadd.f32 %v1280_v0, %v1267_v32  ;;  %v3994_v0 = vld [vmem:[%s5900_s5 + $0xac] sm:$0xf]  ;;  %v3501_v32 = vld [vmem:[%s5900_s5 + $0x54] sm:$0xf0]  ;;  %v3993_v21 = vld [vmem:[%s5900_s5 + $0xa0] sm:$0xf0] }
 0x10d   :  { %v3552_v3 = vor.u32 %v3994_v0, %v3549_v44  ;;  %2295 = vmatpush.bf16.msrb.mxu3 %v3644_v10  ;;  %v3504_v35 = vor.u32 %v3982_v30, %v3501_v32  ;;  %v4001_v0 = vld [vmem:[%s5900_s5 + $0xe0] sm:$0xf0]  ;;  %v3543_v19 = vld [vmem:[%s5900_s5 + $0x98] sm:$0xf] }
 0x10e   :  { %v1295_v45 = vadd.f32 %v1294_v27, %v1281_v40  ;;  %v3516_v27 = vor.u32 %v3985_v22, %v3513_v54  ;;  %v3979_v40 = vld [vmem:[%s5900_s5 + $0x34] sm:$0xf]  ;;  %v3572_v44 = vor.u32 %v4001_v0, %v3571_v63  ;;  %v3544_v22 = vor.u32 %v3993_v21, %v3543_v19  ;;  %v3655_v54 = vld [vmem:[%s5900_s5 + $0x180] sm:$0xf]  ;;  %v3645_v30 = vld [vmem:[%s5900_s5 + $0x174] sm:$0xf0] }
 0x10f   :  { %1841 = vmatmul.bf16.vlgmr.msrb.gmra.mxu0 %v5256_v24  ;;  %v3951_v24 = vld [vmem:[%s5898_s3 + $0x118] sm:$0xf0]  ;;  %v4009_v63 = vld [vmem:[%s5900_s5 + $0x124] sm:$0xf]  ;;  %v3609_v0 = vld [vmem:[%s5900_s5 + $0x12c] sm:$0xf0] }
 0x110   :  { %v3373_v12 = vor.u32 %v3951_v24, %v3372_v9  ;;  %v3540_v9 = vor.u32 %v3991_v4, %v3537_v5  ;;  %v3989_v24 = vld [vmem:[%s5900_s5 + $0x80] sm:$0xf0]  ;;  %v3681_v5 = vld [vmem:[%s5900_s5 + $0x1bc] sm:$0x30]  ;;  %v3651_v19 = vld [vmem:[%s5900_s5 + $0x170] sm:$0xf] }
 0x111   :  { %v1268_v28 = vpop.f32.mrf.mxu3  ;;  %v3524_v14 = vor.u32 %v3989_v24, %v3523_v11  ;;  %2296 = vmatpush.bf16.msrb.mxu3 %v3632_v16  ;;  %v3555_v24 = vld [vmem:[%s5900_s5 + $0xb0] sm:$0xf]  ;;  %v4024_v16 = vld [vmem:[%s5900_s5 + $0x19c] sm:$0xf] }
 0x112   :  { %1851 = vmatpush.bf16.msrb.mxu2 %v3373_v12  ;;  %v1269_v41 = vadd.f32 %v1268_v28, %v1255_v33  ;;  %v3988_v12 = vld [vmem:[%s5900_s5 + $0x7c] sm:$0xf]  ;;  %v3499_v28 = vld [vmem:[%s5900_s5 + $0x48] sm:$0xf]  ;;  %v3607_v33 = vld [vmem:[%s5900_s5 + $0x120] sm:$0xf] }
 0x113   :  { %v3528_v18 = vor.u32 %v3988_v12, %v3525_v2  ;;  %v3556_v12 = vor.u32 %v3996_v13, %v3555_v24  ;;  %v3667_v2 = vld [vmem:[%s5900_s5 + $0x198] sm:$0xf]  ;;  %v4006_v24 = vld [vmem:[%s5900_s5 + $0x10c] sm:$0xf]  ;;  %v4020_v21 = vld [vmem:[%s5900_s5 + $0x178] sm:$0xf0] }
 0x114   :  { %v1336_v42 = vpop.f32.mrf.mxu0  ;;  %v1283_v46 = vadd.f32 %v1282_v25, %v1269_v41  ;;  %v1296_v47 = vpop.f32.mrf.mxu2  ;;  %v3597_v13 = vld [vmem:[%s5900_s5 + $0x114] sm:$0xf0] }
 0x116   :  { %1852 = vmatpush.bf16.msrb.mxu2 %v3361_v17  ;;  %v1297_v50 = vadd.f32 %v1296_v47, %v1283_v46  ;;  %v4013_v17 = vld [vmem:[%s5900_s5 + $0x140] sm:$0xf0] }
 0x117   :  { %v3620_v25 = vor.u32 %v4013_v17, %v3619_v20  ;;  %v3669_v20 = vld [vmem:[%s5900_s5 + $0x1a4] sm:$0xf0] }
 0x118   :  { %v3672_v17 = vor.u32 %v4024_v16, %v3669_v20  ;;  %v3978_v20 = vld [vmem:[%s5900_s5 + $0x28] sm:$0xf0] }
 0x119   :  { %2297 = vmatpush.bf16.msrb.mxu3 %v3620_v25  ;;  %v4022_v25 = vld [vmem:[%s5900_s5 + $0x188] sm:$0xf0] }
 0x11a   :  { %1853 = vmatpush.bf16.msrb.mxu2 %v3349_v29  ;;  %v3983_v29 = vld [vmem:[%s5900_s5 + $0x50] sm:$0xf0] }
 0x11b   :  { %v3500_v31 = vor.u32 %v3983_v29, %v3499_v28  ;;  %v3657_v28 = vld [vmem:[%s5900_s5 + $0x18c] sm:$0xf0]  ;;  %v4018_v29 = vld [vmem:[%s5900_s5 + $0x16c] sm:$0xf] }
 0x11c   :  { %v1338_v58 = vpop.f32.mrf.mxu0  ;;  %v3648_v32 = vor.u32 %v4018_v29, %v3645_v30 }
 0x11e   :  { %1854 = vmatpush.bf16.msrb.mxu2 %v3337_v38  ;;  %v3980_v38 = vld [vmem:[%s5900_s5 + $0x38] sm:$0xf0] }
 0x11f   :  { %v3488_v41 = vor.u32 %v3980_v38, %v3487_v37  ;;  %v4029_v37 = vld [vmem:[%s5900_s5 + $0x1c0] sm:$0x30] }
 0x121   :  { %v1308_v36 = vpop.f32.mrf.mxu1 }
 0x122   :  { %v1309_v48 = vadd.f32 %v1308_v36, %v1295_v45  ;;  %v3608_v36 = vor.u32 %v4010_v34, %v3607_v33  ;;  %v4007_v45 = vld [vmem:[%s5900_s5 + $0x110] sm:$0xf0]  ;;  %v3531_v33 = vld [vmem:[%s5900_s5 + $0x80] sm:$0xf]  ;;  %v3990_v34 = vld [vmem:[%s5900_s5 + $0x88] sm:$0xf0] }
 0x124   :  { %2298 = vmatpush.bf16.msrb.mxu3 %v3608_v36  ;;  %v3687_v36 = vld [vmem:[%s5900_s5 + $0x1b8] sm:$0xf] }
 0x129   :  { %v1322_v43 = vpop.f32.mrf.mxu3  ;;  %v1310_v49 = vpop.f32.mrf.mxu1 }
 0x12a   :  { %v1323_v52 = vadd.f32 %v1322_v43, %v1309_v48  ;;  %v1311_v53 = vadd.f32 %v1310_v49, %v1297_v50  ;;  %v3595_v43 = vld [vmem:[%s5900_s5 + $0x108] sm:$0xf]  ;;  %v3475_v48 = vld [vmem:[%s5900_s5 + $0x18] sm:$0xf]  ;;  %v3977_v49 = vld [vmem:[%s5900_s5 + $0x20] sm:$0xf0] }
 0x12b   :  { %v3596_v47 = vor.u32 %v4007_v45, %v3595_v43  ;;  %v3976_v50 = vld [vmem:[%s5900_s5 + $0x1c] sm:$0xf]  ;;  %v5681_v43 = vld [vmem:[%s5899_s4] sm:$0x7] }
 0x12c   :  { %v1337_v56 = vadd.f32 %v1336_v42, %v1323_v52  ;;  %v3489_v42 = vld [vmem:[%s5900_s5 + $0x3c] sm:$0xf0]  ;;  %v3476_v52 = vor.u32 %v3977_v49, %v3475_v48  ;;  %v3987_v48 = vld [vmem:[%s5900_s5 + $0x70] sm:$0xf0] }
 0x12d   :  { %v3492_v46 = vor.u32 %v3979_v40, %v3489_v42  ;;  %2299 = vmatpush.bf16.msrb.mxu3 %v3596_v47  ;;  %v4015_v40 = vld [vmem:[%s5900_s5 + $0x154] sm:$0xf]  ;;  %v3688_v42 = vor.u32 %v4029_v37, %v3687_v36  ;;  %v3519_v47 = vld [vmem:[%s5900_s5 + $0x68] sm:$0xf]  ;;  %v4017_v36 = vld [vmem:[%s5900_s5 + $0x160] sm:$0xf0] }
 0x12e   :  { %v1343_v51 = vmax.f32 %v1337_v56, 0.0  ;;  %v4004_v56 = vld [vmem:[%s5900_s5 + $0xf8] sm:$0xf0]  ;;  %v3520_v49 = vor.u32 %v3987_v48, %v3519_v47  ;;  %v3627_v47 = vld [vmem:[%s5900_s5 + $0x140] sm:$0xf] }
 0x12f   :  { %v4014_v48 = vld [vmem:[%s5900_s5 + $0x148] sm:$0xf0] }
 0x131   :  { %v1324_v55 = vpop.f32.mrf.mxu3 }
 0x132   :  { %v1325_v57 = vadd.f32 %v1324_v55, %v1311_v53  ;;  %v3477_v53 = vld [vmem:[%s5900_s5 + $0x24] sm:$0xf0]  ;;  %v3583_v55 = vld [vmem:[%s5900_s5 + $0xf0] sm:$0xf] }
 0x134   :  { %v1339_v59 = vadd.f32 %v1338_v58, %v1325_v57  ;;  %v3480_v57 = vor.u32 %v3976_v50, %v3477_v53  ;;  %v3584_v58 = vor.u32 %v4004_v56, %v3583_v55  ;;  %v3621_v53 = vld [vmem:[%s5900_s5 + $0x144] sm:$0xf0]  ;;  %v1428_v55 = vperm.slane %v5681_v43, 0 }
 0x136   :  { %v1346_v60 = vmax.f32 %v1339_v59, 0.0  ;;  %2300 = vmatpush.bf16.msrb.mxu3 %v3584_v58  ;;  %v3463_v59 = vld [vmem:[%s5900_s5] sm:$0xf]  ;;  %v4026_v58 = vld [vmem:[%s5900_s5 + $0x1a8] sm:$0xf0] }
 0x138   :  { %v1349_v61 = vpack.c.bf16 %v1346_v60, %v1343_v51  ;;  %v3974_v51 = vld [vmem:[%s5900_s5 + $0x8] sm:$0xf0]  ;;  %v3973_v60 = vld [vmem:[%s5900_s5 + $0x4] sm:$0xf] }
 0x13a   :  { %3458 = vmatmul.msk.bf16.vlgmr.msrb.gmra.mxu1 %vm1735_vm2, %v1349_v61  ;;  %3459 = vmatmul.msk.bf16.vlgmr.msra.gmra.mxu2 %vm1735_vm2, %v1349_v61 }
 0x13b   :  { %3460 = vmatmul.msk.bf16.vlgmr.msra.gmra.mxu3 %vm1735_vm2, %v1349_v61  ;;  %2281 = vmatpush.bf16.msrb.mxu1 %v3548_v39  ;;  %v3464_v61 = vor.u32 %v3974_v51, %v3463_v59  ;;  %v3468_v39 = vor.u32 %v3973_v60, %v3465_v62  ;;  %v3507_v60 = vld [vmem:[%s5900_s5 + $0x50] sm:$0xf] }
 0x13c   :  { %2323 = vmatpush.bf16.msra.mxu2 %v3552_v3  ;;  %v4027_v3 = vld [vmem:[%s5900_s5 + $0x1b4] sm:$0xf]  ;;  %2301 = vmatpush.bf16.msrb.mxu3 %v3572_v44  ;;  %v3612_v44 = vor.u32 %v4009_v63, %v3609_v0 }
 0x13d   :  { %v3684_v6 = vor.u32 %v4027_v3, %v3681_v5  ;;  %v3495_v5 = vld [vmem:[%s5900_s5 + $0x38] sm:$0xf] }
 0x13f   :  { %v2276_v10 = vsel %vm1739_vm1, %v3684_v6, 0  ;;  %v3981_v6 = vld [vmem:[%s5900_s5 + $0x40] sm:$0xf0] }
 0x140   :  { %2324 = vmatpush.bf16.msra.mxu2 %v3540_v9  ;;  %v3998_v9 = vld [vmem:[%s5900_s5 + $0xc8] sm:$0xf0] }
 0x141   :  { %v3560_v11 = vor.u32 %v3998_v9, %v3559_v8 }
 0x143   :  { %2302 = vmatpush.bf16.msrb.mxu3 %v3560_v11 }
 0x144   :  { %2325 = vmatpush.bf16.msra.mxu2 %v3528_v18 }
 0x147   :  { %2365 = vmatpush.bf16.msra.mxu3 %v3556_v12 }
 0x148   :  { %2326 = vmatpush.bf16.msra.mxu2 %v3516_v27  ;;  %v3656_v27 = vor.u32 %v4022_v25, %v3655_v54  ;;  %v3585_v54 = vld [vmem:[%s5900_s5 + $0xfc] sm:$0xf0] }
 0x14a   :  { %1813 = vmatmul.bf16.vlgmr.msra.gmra.mxu1 %v5323_v23  ;;  %1855 = vmatmul.bf16.vlgmr.msrb.gmra.mxu2 %v5323_v23  ;;  %v3535_v23 = vld [vmem:[%s5900_s5 + $0x90] sm:$0xf] }
 0x14b   :  { %v3536_v7 = vor.u32 %v3992_v1, %v3535_v23  ;;  %v3679_v23 = vld [vmem:[%s5900_s5 + $0x1b0] sm:$0xf]  ;;  %v4028_v1 = vld [vmem:[%s5900_s5 + $0x1b8] sm:$0x30]  ;;  %2366 = vmatpush.bf16.msra.mxu3 %v3544_v22 }
 0x14c   :  { %2327 = vmatpush.bf16.msra.mxu2 %v3504_v35  ;;  %v3680_v4 = vor.u32 %v4028_v1, %v3679_v23  ;;  %v3532_v35 = vor.u32 %v3990_v34, %v3531_v33  ;;  %v3663_v23 = vld [vmem:[%s5900_s5 + $0x188] sm:$0xf] }
 0x14d   :  { %2282 = vmatpush.bf16.msrb.mxu1 %v3536_v7 }
 0x14e   :  { %v2273_v7 = vsel %vm1739_vm1, %v3680_v4, 0  ;;  %v4023_v4 = vld [vmem:[%s5900_s5 + $0x190] sm:$0xf0] }
 0x14f   :  { %2314 = vmatpush.bf16.msra.mxu0 %v2273_v7  ;;  %2367 = vmatpush.bf16.msra.mxu3 %v3532_v35  ;;  %v3664_v9 = vor.u32 %v4023_v4, %v3663_v23  ;;  %v3639_v35 = vld [vmem:[%s5900_s5 + $0x158] sm:$0xf]  ;;  %v4008_v23 = vld [vmem:[%s5900_s5 + $0x118] sm:$0xf0] }
 0x150   :  { %2328 = vmatpush.bf16.msra.mxu2 %v3492_v46  ;;  %v2279_v46 = vsel %vm1739_vm1, %v3688_v42, 0 }
 0x151   :  { %2283 = vmatpush.bf16.msrb.mxu1 %v3524_v14  ;;  %v3668_v14 = vor.u32 %v4025_v15, %v3667_v2  ;;  %v3600_v15 = vor.u32 %v4006_v24, %v3597_v13 }
 0x153   :  { %2315 = vmatpush.bf16.msra.mxu0 %v3668_v14  ;;  %2368 = vmatpush.bf16.msra.mxu3 %v3520_v49  ;;  %v3483_v14 = vld [vmem:[%s5900_s5 + $0x20] sm:$0xf]  ;;  %v3997_v49 = vld [vmem:[%s5900_s5 + $0xc4] sm:$0xf] }
 0x154   :  { %2329 = vmatpush.bf16.msra.mxu2 %v3480_v57  ;;  %v3675_v57 = vld [vmem:[%s5900_s5 + $0x1a0] sm:$0xf]  ;;  %v3484_v22 = vor.u32 %v3978_v20, %v3483_v14  ;;  %v4002_v20 = vld [vmem:[%s5900_s5 + $0xe8] sm:$0xf0] }
 0x155   :  { %2284 = vmatpush.bf16.msrb.mxu1 %v3512_v26  ;;  %v4021_v26 = vld [vmem:[%s5900_s5 + $0x184] sm:$0xf]  ;;  %v3676_v51 = vor.u32 %v4026_v58, %v3675_v57  ;;  %v3615_v58 = vld [vmem:[%s5900_s5 + $0x128] sm:$0xf]  ;;  %v3579_v14 = vld [vmem:[%s5900_s5 + $0xe0] sm:$0xf] }
 0x156   :  { %v1758_v18 = vpop.f32.mrf.mxu2  ;;  %v1800_v1 = vpop.f32.mrf.mxu3 }
 0x157   :  { %2316 = vmatpush.bf16.msra.mxu0 %v3656_v27  ;;  %v3975_v27 = vld [vmem:[%s5900_s5 + $0x10] sm:$0xf0] }
 0x158   :  { %2330 = vmatpush.bf16.msra.mxu2 %v3468_v39  ;;  %v1759_v39 = vadd.f32 %v1758_v18, %v1428_v55 }
 0x159   :  { %2285 = vmatpush.bf16.msrb.mxu1 %v3500_v31  ;;  %v3660_v31 = vor.u32 %v4021_v26, %v3657_v28  ;;  %v3471_v26 = vld [vmem:[%s5900_s5 + $0x8] sm:$0xf]  ;;  %v4000_v28 = vld [vmem:[%s5900_s5 + $0xdc] sm:$0xf] }
 0x15a   :  { %v3472_v33 = vor.u32 %v3975_v27, %v3471_v26  ;;  %v4037_v26 = vld [vmem:[%s5902_s7 + $0x38] sm:$0xff]  ;;  %v4036_v27 = vld [vmem:[%s5902_s7 + $0x30] sm:$0xff] }
 0x15b   :  { %2337 = vmatpush.bf16.msrb.mxu0 %v3648_v32  ;;  %v3652_v32 = vor.u32 %v4020_v21, %v3651_v19  ;;  %v3580_v19 = vor.u32 %v4002_v20, %v3579_v14 }
 0x15c   :  { %2398 = vmatpush.bf16.msrb.mxu2 %v2279_v46  ;;  %v3640_v46 = vor.u32 %v4017_v36, %v3639_v35  ;;  %v4043_v35 = vld [vmem:[%s5902_s7 + $0x68] sm:$0xff]  ;;  %v4030_v36 = vld [vmem:[%s5902_s7] sm:$0xff] }
 0x15d   :  { %2286 = vmatpush.bf16.msrb.mxu1 %v3488_v41  ;;  %v3633_v41 = vld [vmem:[%s5900_s5 + $0x15c] sm:$0xf0] }
 0x15e   :  { %v3636_v45 = vor.u32 %v4015_v40, %v3633_v41  ;;  %v1760_v50 = vpop.f32.mrf.mxu2  ;;  %v1429_v41 = vperm.slane %v5681_v43, 1 }
 0x15f   :  { %v1761_v7 = vadd.f32 %v1760_v50, %v1428_v55  ;;  %v3561_v50 = vld [vmem:[%s5900_s5 + $0xcc] sm:$0xf0]  ;;  %v3628_v55 = vor.u32 %v4014_v48, %v3627_v47 }
 0x160   :  { %2338 = vmatpush.bf16.msrb.mxu0 %v3636_v45  ;;  %2399 = vmatpush.bf16.msrb.mxu2 %v3676_v51 }
 0x161   :  { %2287 = vmatpush.bf16.msrb.mxu1 %v3476_v52  ;;  %v4012_v52 = vld [vmem:[%s5900_s5 + $0x13c] sm:$0xf] }
 0x162   :  { %v3624_v56 = vor.u32 %v4012_v52, %v3621_v53  ;;  %v3564_v52 = vor.u32 %v3997_v49, %v3561_v50  ;;  %v1801_v53 = vadd.f32 %v1800_v1, %v1429_v41  ;;  %v4039_v49 = vld [vmem:[%s5902_s7 + $0x48] sm:$0xff] }
 0x163   :  { %v4047_v50 = vld [vmem:[%s5902_s7 + $0x88] sm:$0xff] }
 0x164   :  { %2339 = vmatpush.bf16.msrb.mxu0 %v3624_v56  ;;  %2400 = vmatpush.bf16.msrb.mxu2 %v3664_v9  ;;  %v1430_v56 = vperm.slane %v5681_v43, 2  ;;  %v3591_v9 = vld [vmem:[%s5900_s5 + $0xf8] sm:$0xf] }
 0x165   :  { %2288 = vmatpush.bf16.msrb.mxu1 %v3464_v61  ;;  %v3984_v61 = vld [vmem:[%s5900_s5 + $0x58] sm:$0xf0] }
 0x166   :  { %v3508_v62 = vor.u32 %v3984_v61, %v3507_v60 }
 0x168   :  { %2369 = vmatpush.bf16.msra.mxu3 %v3508_v62  ;;  %2340 = vmatpush.bf16.msrb.mxu0 %v3612_v44  ;;  %v3603_v44 = vld [vmem:[%s5900_s5 + $0x110] sm:$0xf] }
 0x169   :  { %2356 = vmatpush.bf16.msra.mxu1 %v2276_v10  ;;  %v3496_v10 = vor.u32 %v3981_v6, %v3495_v5  ;;  %v3604_v5 = vor.u32 %v4008_v23, %v3603_v44 }
 0x16c   :  { %2370 = vmatpush.bf16.msra.mxu3 %v3496_v10  ;;  %2341 = vmatpush.bf16.msrb.mxu0 %v3600_v15  ;;  %v4005_v10 = vld [vmem:[%s5900_s5 + $0x100] sm:$0xf0] }
 0x16d   :  { %2357 = vmatpush.bf16.msra.mxu1 %v3672_v17  ;;  %v4003_v17 = vld [vmem:[%s5900_s5 + $0xf4] sm:$0xf]  ;;  %v3592_v15 = vor.u32 %v4005_v10, %v3591_v9 }
 0x16e   :  { %v3588_v25 = vor.u32 %v4003_v17, %v3585_v54  ;;  %v3999_v54 = vld [vmem:[%s5900_s5 + $0xd0] sm:$0xf0] }
 0x170   :  { %2371 = vmatpush.bf16.msra.mxu3 %v3484_v22  ;;  %2342 = vmatpush.bf16.msrb.mxu0 %v3588_v25  ;;  %v3567_v22 = vld [vmem:[%s5900_s5 + $0xc8] sm:$0xf] }
 0x171   :  { %2358 = vmatpush.bf16.msra.mxu1 %v3660_v31  ;;  %v3573_v31 = vld [vmem:[%s5900_s5 + $0xe4] sm:$0xf0]  ;;  %v3568_v25 = vor.u32 %v3999_v54, %v3567_v22 }
 0x172   :  { %v3576_v37 = vor.u32 %v4000_v28, %v3573_v31  ;;  %v4035_v28 = vld [vmem:[%s5902_s7 + $0x28] sm:$0xff]  ;;  %v4045_v31 = vld [vmem:[%s5902_s7 + $0x78] sm:$0xff] }
 0x174   :  { %2372 = vmatpush.bf16.msra.mxu3 %v3472_v33  ;;  %2343 = vmatpush.bf16.msrb.mxu0 %v3576_v37  ;;  %v4044_v33 = vld [vmem:[%s5902_s7 + $0x70] sm:$0xff]  ;;  %v4042_v37 = vld [vmem:[%s5902_s7 + $0x60] sm:$0xff] }
 0x178   :  { %2344 = vmatpush.bf16.msrb.mxu0 %v3564_v52  ;;  %v1960_v52 = vld [vmem:[%s5901_s6] sm:$0x7] }
 0x17c   :  { %v1772_v38 = vpop.f32.mrf.mxu0 }
 0x17d   :  { %v1773_v8 = vadd.f32 %v1772_v38, %v1759_v39  ;;  %v1802_v38 = vpop.f32.mrf.mxu3 }
 0x17e   :  { %v1803_v61 = vadd.f32 %v1802_v38, %v1429_v41  ;;  %v3766_v41 = vld [vmem:[%s5902_s7 + $0x90] sm:$0xf] }
 0x184   :  { %v1774_v3 = vpop.f32.mrf.mxu0 }
 0x185   :  { %v1775_v12 = vadd.f32 %v1774_v3, %v1761_v7 }
 0x18c   :  { %v1842_v42 = vpop.f32.mrf.mxu0 }
 0x18d   :  { %v1843_v0 = vadd.f32 %v1842_v42, %v1430_v56  ;;  %v4048_v42 = vld [vmem:[%s5902_s7 + $0x90] sm:$0x30] }
 0x194   :  { %v1844_v1 = vpop.f32.mrf.mxu0 }
 0x195   :  { %v1845_v6 = vadd.f32 %v1844_v1, %v1430_v56 }
 0x1b7   :  { %v1786_v59 = vpop.f32.mrf.mxu1 }
 0x1b8   :  { %v1787_v2 = vadd.f32 %v1786_v59, %v1773_v8  ;;  %v4011_v59 = vld [vmem:[%s5900_s5 + $0x130] sm:$0xf0] }
 0x1b9   :  { %v3616_v63 = vor.u32 %v4011_v59, %v3615_v58 }
 0x1ba   :  { %v1875_v29 = vmax.f32 %v1787_v2, 0.0 }
 0x1bd   :  { %v5727_v11 = vpop.f32.mrf.mxu2 }
 0x1be   :  { %v1870_v51 = vpop.f32.mrf.mxu3 }
 0x1bf   :  { %v1788_v16 = vpop.f32.mrf.mxu1 }
 0x1c0   :  { %v1789_v18 = vadd.f32 %v1788_v16, %v1775_v12 }
 0x1c2   :  { %v1878_v30 = vmax.f32 %v1789_v18, 0.0 }
 0x1c4   :  { %v5765_v34 = vpack.c.bf16 %v1878_v30, %v1875_v29  ;;  %v4034_v29 = vld [vmem:[%s5902_s7 + $0x20] sm:$0xff]  ;;  %v4033_v30 = vld [vmem:[%s5902_s7 + $0x18] sm:$0xff] }
 0x1c5   :  { %v1830_v40 = vpop.f32.mrf.mxu2 }
 0x1c6   :  { %2289 = vmatmul.bf16.vlgmr.msrb.gmra.mxu1 %v5765_v34  ;;  %2331 = vmatmul.bf16.vlgmr.msra.gmra.mxu2 %v5765_v34  ;;  %v1872_v2 = vpop.f32.mrf.mxu3 }
 0x1c7   :  { %v1814_v45 = vpop.f32.mrf.mxu1  ;;  %2379 = vmatpush.bf16.msrb.mxu1 %v3652_v32  ;;  %2591 = vmatpush.bf16.msra.mxu2 %v4045_v31  ;;  %v4032_v32 = vld [vmem:[%s5902_s7 + $0x10] sm:$0xff] }
 0x1c8   :  { %v1815_v57 = vadd.f32 %v1814_v45, %v1801_v53  ;;  %v4040_v45 = vld [vmem:[%s5902_s7 + $0x50] sm:$0xff]  ;;  %v4038_v53 = vld [vmem:[%s5902_s7 + $0x40] sm:$0xff] }
 0x1ca   :  { %v1829_v39 = vadd.f32 %v5727_v11, %v1815_v57  ;;  %v4046_v57 = vld [vmem:[%s5902_s7 + $0x80] sm:$0xff] }
 0x1cb   :  { %2380 = vmatpush.bf16.msrb.mxu1 %v3640_v46  ;;  %2592 = vmatpush.bf16.msra.mxu2 %v4044_v33  ;;  %v3767_v46 = vor.u32 %v4048_v42, %v3766_v41 }
 0x1cc   :  { %v1876_v7 = vmax.f32 %v1829_v39, 0.0 }
 0x1cd   :  { %v1856_v60 = vpop.f32.mrf.mxu2  ;;  %v2575_v47 = vsel %vm1739_vm1, %v3767_v46, 0 }
 0x1ce   :  { %v1857_v3 = vadd.f32 %v1856_v60, %v1843_v0 }
 0x1cf   :  { %v1816_v62 = vpop.f32.mrf.mxu1  ;;  %2381 = vmatpush.bf16.msrb.mxu1 %v3628_v55  ;;  %2593 = vmatpush.bf16.msra.mxu2 %v4043_v35  ;;  %v1962_v55 = vperm.slane %v1960_v52, 0 }
 0x1d0   :  { %v1817_v43 = vadd.f32 %v1816_v62, %v1803_v61  ;;  %v1871_v24 = vadd.f32 %v1870_v51, %v1857_v3 }
 0x1d2   :  { %v1831_v4 = vadd.f32 %v1830_v40, %v1817_v43  ;;  %v1877_v17 = vmax.f32 %v1871_v24, 0.0  ;;  %v4041_v40 = vld [vmem:[%s5902_s7 + $0x58] sm:$0xff] }
 0x1d3   :  { %2382 = vmatpush.bf16.msrb.mxu1 %v3616_v63  ;;  %2594 = vmatpush.bf16.msra.mxu2 %v4042_v37 }
 0x1d4   :  { %v1879_v8 = vmax.f32 %v1831_v4, 0.0 }
 0x1d5   :  { %v1858_v11 = vpop.f32.mrf.mxu2 }
 0x1d6   :  { %v1882_v13 = vpack.c.bf16 %v1879_v8, %v1876_v7  ;;  %v1859_v12 = vadd.f32 %v1858_v11, %v1845_v6  ;;  %v1964_v7 = vperm.slane %v1960_v52, 2 }
 0x1d7   :  { %2383 = vmatpush.bf16.msrb.mxu1 %v3604_v5  ;;  %2595 = vmatpush.bf16.msra.mxu2 %v4041_v40  ;;  %v1963_v5 = vperm.slane %v1960_v52, 1 }
 0x1d8   :  { %v1873_v16 = vadd.f32 %v1872_v2, %v1859_v12  ;;  %2303 = vmatmul.bf16.vlgmr.msrb.gmra.mxu3 %v1882_v13 }
 0x1d9   :  { %2610 = vmatpush.bf16.msrb.mxu3 %v2575_v47 }
 0x1da   :  { %v1880_v18 = vmax.f32 %v1873_v16, 0.0 }
 0x1db   :  { %2384 = vmatpush.bf16.msrb.mxu1 %v3592_v15  ;;  %2596 = vmatpush.bf16.msra.mxu2 %v4040_v45 }
 0x1dc   :  { %v1883_v21 = vpack.c.bf16 %v1880_v18, %v1877_v17 }
 0x1dd   :  { %2611 = vmatpush.bf16.msrb.mxu3 %v4047_v50 }
 0x1de   :  { %3689 = vmatmul.msk.bf16.vlgmr.msra.gmra.mxu0 %vm1735_vm2, %v1883_v21  ;;  %3690 = vmatmul.msk.bf16.vlgmr.msra.gmra.mxu1 %vm1735_vm2, %v1883_v21 }
 0x1df   :  { %3691 = vmatmul.msk.bf16.vlgmr.msrb.gmra.mxu2 %vm1735_vm2, %v1883_v21  ;;  %2385 = vmatpush.bf16.msrb.mxu1 %v3580_v19 }
 0x1e0   :  { %2577 = vmatpush.bf16.msra.mxu0 %v4037_v26  ;;  %2597 = vmatpush.bf16.msra.mxu2 %v4039_v49 }
 0x1e1   :  { %2612 = vmatpush.bf16.msrb.mxu3 %v4046_v57 }
 0x1e3   :  { %2386 = vmatpush.bf16.msrb.mxu1 %v3568_v25 }
 0x1e4   :  { %2578 = vmatpush.bf16.msra.mxu0 %v4036_v27  ;;  %2598 = vmatpush.bf16.msra.mxu2 %v4038_v53 }
 0x1e8   :  { %2373 = vmatmul.bf16.vlgmr.msra.gmra.mxu3 %v5765_v34  ;;  %2579 = vmatpush.bf16.msra.mxu0 %v4035_v28  ;;  %v4031_v34 = vld [vmem:[%s5902_s7 + $0x8] sm:$0xff] }
 0x1ec   :  { %2580 = vmatpush.bf16.msra.mxu0 %v4034_v29 }
 0x1ee   :  { %2345 = vmatmul.bf16.vlgmr.msrb.gmra.mxu0 %v1882_v13  ;;  %2387 = vmatmul.bf16.vlgmr.msrb.gmra.mxu1 %v1882_v13 }
 0x1f0   :  { %2581 = vmatpush.bf16.msra.mxu0 %v4033_v30 }
 0x1f4   :  { %2582 = vmatpush.bf16.msra.mxu0 %v4032_v32 }
 0x1f8   :  { %2583 = vmatpush.bf16.msra.mxu0 %v4031_v34  ;;  %v4052_v34 = vld [vmem:[%s5903_s8] ss:$0 sm:$0xff] }
 0x1fc   :  { %2584 = vmatpush.bf16.msra.mxu0 %v4030_v36 }
 0x243   :  { %v2290_v38 = vpop.f32.mrf.mxu1 }
 0x244   :  { %v2291_v60 = vadd.f32 %v2290_v38, %v1962_v55 }
 0x249   :  { %v2332_v56 = vpop.f32.mrf.mxu2 }
 0x24a   :  { %v2333_v24 = vadd.f32 %v2332_v56, %v1963_v5 }
 0x24b   :  { %v2292_v48 = vpop.f32.mrf.mxu1 }
 0x24c   :  { %v2293_v62 = vadd.f32 %v2292_v48, %v1962_v55 }
 0x251   :  { %v2334_v23 = vpop.f32.mrf.mxu2 }
 0x252   :  { %v2335_v2 = vadd.f32 %v2334_v23, %v1963_v5 }
 0x25b   :  { %v2304_v58 = vpop.f32.mrf.mxu3  ;;  %v2318_v59 = vpop.f32.mrf.mxu0 }
 0x25c   :  { %v2360_v51 = vpop.f32.mrf.mxu1  ;;  %v2305_v61 = vadd.f32 %v2304_v58, %v2291_v60 }
 0x25e   :  { %v2319_v39 = vadd.f32 %v2318_v59, %v2305_v61 }
 0x260   :  { %v2407_v3 = vmax.f32 %v2319_v39, 0.0 }
 0x262   :  { %v2402_v11 = vpop.f32.mrf.mxu2 }
 0x263   :  { %v2306_v63 = vpop.f32.mrf.mxu3  ;;  %v2320_v0 = vpop.f32.mrf.mxu0 }
 0x264   :  { %v2307_v43 = vadd.f32 %v2306_v63, %v2293_v62  ;;  %v2362_v44 = vpop.f32.mrf.mxu1 }
 0x266   :  { %v2321_v1 = vadd.f32 %v2320_v0, %v2307_v43 }
 0x268   :  { %v2410_v4 = vmax.f32 %v2321_v1, 0.0 }
 0x26a   :  { %v2413_v6 = vpack.c.bf16 %v2410_v4, %v2407_v3  ;;  %v2404_v25 = vpop.f32.mrf.mxu2 }
 0x26b   :  { %v2346_v8 = vpop.f32.mrf.mxu0  ;;  %v2374_v9 = vpop.f32.mrf.mxu3 }
 0x26c   :  { %v2388_v10 = vpop.f32.mrf.mxu1  ;;  %2585 = vmatmul.bf16.vlgmr.msra.gmra.mxu0 %v2413_v6  ;;  %v2375_v13 = vadd.f32 %v2374_v9, %v1964_v7  ;;  %v2347_v12 = vadd.f32 %v2346_v8, %v2333_v24 }
 0x26e   :  { %v2389_v15 = vadd.f32 %v2388_v10, %v2375_v13  ;;  %v2361_v20 = vadd.f32 %v2360_v51, %v2347_v12 }
 0x270   :  { %v2403_v21 = vadd.f32 %v2402_v11, %v2389_v15  ;;  %v2408_v26 = vmax.f32 %v2361_v20, 0.0 }
 0x272   :  { %v2409_v29 = vmax.f32 %v2403_v21, 0.0 }
 0x273   :  { %v2348_v16 = vpop.f32.mrf.mxu0  ;;  %v2376_v14 = vpop.f32.mrf.mxu3 }
 0x274   :  { %v2349_v17 = vadd.f32 %v2348_v16, %v2335_v2  ;;  %v2377_v18 = vadd.f32 %v2376_v14, %v1964_v7  ;;  %v2390_v19 = vpop.f32.mrf.mxu1 }
 0x276   :  { %v2363_v22 = vadd.f32 %v2362_v44, %v2349_v17  ;;  %v2391_v54 = vadd.f32 %v2390_v19, %v2377_v18 }
 0x278   :  { %v2411_v27 = vmax.f32 %v2363_v22, 0.0  ;;  %v2405_v28 = vadd.f32 %v2404_v25, %v2391_v54 }
 0x27a   :  { %v2414_v30 = vpack.c.bf16 %v2411_v27, %v2408_v26  ;;  %v2412_v31 = vmax.f32 %v2405_v28, 0.0 }
 0x27c   :  { %v2415_v32 = vpack.c.bf16 %v2412_v31, %v2409_v29  ;;  %2599 = vmatmul.bf16.vlgmr.msra.gmra.mxu2 %v2414_v30 }
 0x27e   :  { %3768 = vmatmul.msk.bf16.vlgmr.msrb.gmra.mxu3 %vm1735_vm2, %v2415_v32 }
 0x2e9   :  { %v2586_v33 = vpop.f32.mrf.mxu0 }
 0x2ea   :  { %v2587_v35 = vadd.f32 %v4052_v34, %v2586_v33 }
 0x2f1   :  { %v2588_v41 = vpop.f32.mrf.mxu0 }
 0x2f2   :  { %v2589_v42 = vadd.f32 %v4052_v34, %v2588_v41 }
 0x2ff   :  { %v2600_v36 = vpop.f32.mrf.mxu2 }
 0x300   :  { %v2601_v37 = vadd.f32 %v2600_v36, %v2587_v35 }
 0x301   :  { %v2614_v38 = vpop.f32.mrf.mxu3 }
 0x302   :  { %v2615_v40 = vadd.f32 %v2614_v38, %v2601_v37 }
 0x304   :  { %2619 = vst [vmem:[#allocation2] sm:$0xff] %v2615_v40 }
 0x307   :  { %v2602_v45 = vpop.f32.mrf.mxu2 }
 0x308   :  { %v2603_v46 = vadd.f32 %v2602_v45, %v2589_v42 }
 0x309   :  { %v2616_v47 = vpop.f32.mrf.mxu3 }
 0x30a   :  { %v2617_v48 = vadd.f32 %v2616_v47, %v2603_v46 }
 0x30c   :  { %2620 = vst [vmem:[#allocation2 + $0x8] sm:$0xff] %v2617_v48 }
 0x30d   :  { %2624 = vsyncadd [#allocation3], 128  ;;  %s2627_s30 = sshll.u32 %s5904_s9, 4  ;;  %s4079_s10 = smov [#allocation2]   ;;  %s2628_s30 = int_to_ptr.hbm [resolvable:$true] %s2627_s30 }
 0x30e   :  { %s2625_s8 = sshll.u32 %s4079_s10, 4  ;;  %s4080_s11 = smov 128   ;;  %s2626_s8 = int_to_ptr.vmem [resolvable:$true] %s2625_s8 }
 0x30f   :  { %s4081_s12 = smov 8  }
 0x310   :  { %2633 = dma.vmem_to_hbm [thread:$0]  %s2626_s8, 128, %s2628_s30, [#allocation3], %s4080_s11, %s4080_s11, %s4081_s12  }
 0x311   :  { %4077 = dma.done.wait [#allocation3], 256  }
 0x312   :  { %4078 = vsyncadd [#allocation3], 4294967040 }
 0x313   :  { %2638 = vsyncpa [#allocation3], 1 }

</bundles_post_ra>
